<compile_context>
chip_gen: v6e
topology: v6e:2x2x1
jax: 0.10.0
libtpu: 0.0.40
codegen_flags: <defaults>
</compile_context>

<pallas_src>
import math
import functools

import jax
import jax.numpy as jnp
from jax.experimental import pallas as pl
from jax.experimental.pallas import tpu as pltpu


def _rmsnorm(h, w, eps):
    var = jnp.mean(h * h, axis=-1, keepdims=True)
    return h * jax.lax.rsqrt(var + eps) * w


def _rot_halves(t, head_dim):
    """Flat left/right rotations by head_dim//2 over a (rows, n_heads*head_dim) slab.

    Per head, rotate_half(t) == select(j < d/2, -left, right); the sign/selection is
    folded into the precomputed sin_lo / sin_hi tables, so RoPE becomes
        t * cos + left * sin_lo + right * sin_hi
    in one wide VPU pass over ALL heads (no per-head slicing).
    TODO(synk): at real head_dim (multiple of 128) map these to pltpu.roll (XLU slot).
    """
    half = head_dim // 2
    left = jnp.concatenate([t[:, half:], t[:, :half]], axis=-1)
    right = jnp.concatenate([t[:, -half:], t[:, :-half]], axis=-1)
    return left, right


def decoder_layer_kernel(xt_ref, xf_ref,
                         cosq_ref, sinloq_ref, sinhiq_ref,
                         cosk_ref, sinlok_ref, sinhik_ref,
                         w_in_ref, w_post_ref,
                         wq_ref, wkv_ref, wo_ref, wgu_ref, wd_ref,
                         out_ref,
                         k_scr, v_scr,
                         *, num_heads, num_kv_heads, head_dim, inter, eps,
                         causal, tq, seq_len):
    qi = pl.program_id(1)
    d = head_dim
    kvd = num_kv_heads * d
    rep = num_heads // num_kv_heads
    scale = 1.0 / math.sqrt(d)
    S = seq_len

    # ---- K/V for the whole sequence: computed once per batch row (query tile 0),
    #      RoPE'd K and V stay resident in bf16 VMEM scratch for all later tiles. ----
    @pl.when(qi == 0)
    def _():
        xf = xf_ref[0]                                         # (S, H) f32
        hf = _rmsnorm(xf, w_in_ref[0], eps)
        kv = jnp.dot(hf.astype(jnp.bfloat16), wkv_ref[...],
                     preferred_element_type=jnp.float32)       # (S, 2*kvd)
        k = kv[:, :kvd]
        v = kv[:, kvd:]
        kl, kr = _rot_halves(k, d)
        k = k * cosk_ref[...] + kl * sinlok_ref[...] + kr * sinhik_ref[...]
        k_scr[...] = k.astype(jnp.bfloat16)
        v_scr[...] = v.astype(jnp.bfloat16)

    # ---- per-query-tile work ----
    xt = xt_ref[0]                                             # (tq, H) f32
    H = xt.shape[-1]
    residual = xt
    ht = _rmsnorm(xt, w_in_ref[0], eps)
    q = jnp.dot(ht.astype(jnp.bfloat16), wq_ref[...],
                preferred_element_type=jnp.float32)            # (tq, H)
    ql, qr = _rot_halves(q, d)
    # RoPE for all query heads in one pass; fold 1/sqrt(d) into q here.
    q = (q * cosq_ref[...] + ql * sinloq_ref[...] + qr * sinhiq_ref[...]) * scale

    k_all = k_scr[...]                                         # (S, kvd) bf16
    v_all = v_scr[...]                                         # (S, kvd) bf16
    wo = wo_ref[...]                                           # (H, H)  bf16

    if causal:
        # Fused causal mask: no materialized f32 bias, no rep-stacked concat.
        ri = jax.lax.broadcasted_iota(jnp.int32, (rep * tq, S), 0)
        ci = jax.lax.broadcasted_iota(jnp.int32, (rep * tq, S), 1)
        keep = ci <= (qi * tq + ri % tq)

    attn = jnp.zeros((tq, H), jnp.float32)
    # GQA: one QK^T / PV matmul per KV group with the `rep` query heads stacked
    # along rows; o_proj is fused into the loop (per-group accumulation into an
    # (tq, H) f32 value), so no per-head VMEM scatter is needed.
    for g in range(num_kv_heads):
        kg = k_all[:, g * d:(g + 1) * d]                       # (S, d) bf16
        vg = v_all[:, g * d:(g + 1) * d]                       # (S, d) bf16
        qg = jnp.concatenate(
            [q[:, (g * rep + r) * d:(g * rep + r + 1) * d] for r in range(rep)],
            axis=0)                                            # (rep*tq, d)

        s = jax.lax.dot_general(
            qg.astype(jnp.bfloat16), kg,
            (((1,), (1,)), ((), ())),
            preferred_element_type=jnp.float32)                # (rep*tq, S)
        if causal:
            s = jnp.where(keep, s, -1e9)
        s = s - jnp.max(s, axis=-1, keepdims=True)
        e = jnp.exp(s)
        p = e * pl.reciprocal(jnp.sum(e, axis=-1, keepdims=True), approx=True)
        og = jnp.dot(p.astype(jnp.bfloat16), vg,
                     preferred_element_type=jnp.float32)       # (rep*tq, d)

        # restack the group's heads along lanes -> (tq, rep*d) and fuse o_proj
        og = jnp.concatenate([og[r * tq:(r + 1) * tq, :] for r in range(rep)],
                             axis=1)
        attn = attn + jnp.dot(og.astype(jnp.bfloat16),
                              wo[g * rep * d:(g + 1) * rep * d, :],
                              preferred_element_type=jnp.float32)

    x1 = residual + attn

    # ---- SwiGLU MLP ----
    h2 = _rmsnorm(x1, w_post_ref[0], eps)
    gu = jnp.dot(h2.astype(jnp.bfloat16), wgu_ref[...],
                 preferred_element_type=jnp.float32)           # (tq, 2*inter)
    gate = gu[:, :inter]
    up = gu[:, inter:]
    act = gate * jax.nn.sigmoid(gate)                          # SiLU in f32
    down = jnp.dot((act * up).astype(jnp.bfloat16), wd_ref[...],
                   preferred_element_type=jnp.float32)
    out_ref[0] = (x1 + down).astype(out_ref.dtype)


def prepare_decoder_params(params):
    """One-time weight fusion + bf16 cast (do NOT redo this per forward call)."""
    return {
        "w_in": params["w_in"].reshape(1, -1).astype(jnp.float32),
        "w_post": params["w_post"].reshape(1, -1).astype(jnp.float32),
        "wq": params["wq"].astype(jnp.bfloat16),
        "wkv": jnp.concatenate([params["wk"], params["wv"]], axis=1).astype(jnp.bfloat16),
        "wo": params["wo"].astype(jnp.bfloat16),
        "wgu": jnp.concatenate([params["wg"], params["wu"]], axis=1).astype(jnp.bfloat16),
        "wd": params["wd"].astype(jnp.bfloat16),
    }


def prepare_rope(cos, sin, num_heads, num_kv_heads):
    """Pre-tile cos/sin per head and fold the rotate_half sign into sin tables."""
    S, d = cos.shape
    half = d // 2
    lo = (jnp.arange(d) < half)[None, :]
    sin_lo = jnp.where(lo, -sin, 0.0)
    sin_hi = jnp.where(lo, 0.0, sin)
    cos_q = jnp.tile(cos, (1, num_heads)).astype(jnp.float32)
    sin_lo_q = jnp.tile(sin_lo, (1, num_heads)).astype(jnp.float32)
    sin_hi_q = jnp.tile(sin_hi, (1, num_heads)).astype(jnp.float32)
    kvd = num_kv_heads * d
    return (cos_q, sin_lo_q, sin_hi_q,
            cos_q[:, :kvd], sin_lo_q[:, :kvd], sin_hi_q[:, :kvd])


def decoder_layer(x, rope, prepped, *, num_heads, num_kv_heads, eps, causal=True):
    B, S, H = x.shape
    head_dim = H // num_heads
    kvd = num_kv_heads * head_dim
    inter = prepped["wd"].shape[0]
    rep = num_heads // num_kv_heads

    # query-tile size: multiple of 8 sublanes; keeps rep*tq MXU-friendly at scale.
    tq = S if S <= 256 else 256
    assert S % tq == 0, "seq_len must be a multiple of the query tile"

    cos_q, sin_lo_q, sin_hi_q, cos_k, sin_lo_k, sin_hi_k = rope

    kern = functools.partial(
        decoder_layer_kernel,
        num_heads=num_heads, num_kv_heads=num_kv_heads, head_dim=head_dim,
        inter=inter, eps=eps, causal=causal, tq=tq, seq_len=S)

    def const(shape):
        return pl.BlockSpec(shape, lambda b, s: (0,) * len(shape))

    in_specs = [
        pl.BlockSpec((1, tq, H), lambda b, s: (b, s, 0)),   # x: query tile / residual / MLP
        pl.BlockSpec((1, S, H), lambda b, s: (b, 0, 0)),    # x: full seq (K/V at tile 0)
        pl.BlockSpec((tq, H), lambda b, s: (s, 0)),         # cos (q, per-head tiled)
        pl.BlockSpec((tq, H), lambda b, s: (s, 0)),         # sin_lo (q)
        pl.BlockSpec((tq, H), lambda b, s: (s, 0)),         # sin_hi (q)
        const((S, kvd)),                                    # cos (k)
        const((S, kvd)),                                    # sin_lo (k)
        const((S, kvd)),                                    # sin_hi (k)
        const((1, H)),                                      # input_layernorm.weight
        const((1, H)),                                      # post_attention_layernorm.weight
        const((H, H)),                                      # q_proj
        const((H, 2 * kvd)),                                # fused k|v
        const((H, H)),                                      # o_proj
        const((H, 2 * inter)),                              # fused gate|up
        const((inter, H)),                                  # down_proj
    ]

    # VMEM budget: blocks (double-buffered) + scratch + temporaries, clamped to a
    # v7x-safe ceiling (64 MiB physical).
    weight_bytes = 2 * (2 * H * H + 2 * H * kvd + 3 * H * inter)          # bf16
    act_bytes = (S * H + 6 * tq * H + 3 * S * kvd) * 4 + 2 * S * kvd * 2
    tmp_bytes = (8 * rep * tq * S + 6 * tq * max(2 * inter, H)) * 4
    vmem_limit = int(min(max(4 * (weight_bytes + act_bytes + tmp_bytes), 32 << 20),
                         56 << 20))

    flops = int(2 * B * S * (2 * H * H + 2 * H * kvd + 3 * H * inter)
                + 4 * B * S * S * H)
    transcendentals = int(B * num_heads * S * S + B * S * inter)
    bytes_accessed = int(2 * B * S * H * 4 + 3 * S * (H + kvd) * 4
                         + (2 * H * H + 2 * H * kvd + 3 * H * inter) * 2 + 2 * H * 4)

    return pl.pallas_call(
        kern,
        out_shape=jax.ShapeDtypeStruct((B, S, H), x.dtype),
        grid=(B, S // tq),
        in_specs=in_specs,
        out_specs=pl.BlockSpec((1, tq, H), lambda b, s: (b, s, 0)),
        scratch_shapes=[pltpu.VMEM((S, kvd), jnp.bfloat16),   # RoPE'd K
                        pltpu.VMEM((S, kvd), jnp.bfloat16)],  # V
        compiler_params=pltpu.CompilerParams(
            dimension_semantics=("parallel", "arbitrary"),
            vmem_limit_bytes=vmem_limit),
        cost_estimate=pl.CostEstimate(
            flops=flops, transcendentals=transcendentals,
            bytes_accessed=bytes_accessed),
    )(x, x, cos_q, sin_lo_q, sin_hi_q, cos_k, sin_lo_k, sin_hi_k,
      prepped["w_in"], prepped["w_post"], prepped["wq"], prepped["wkv"],
      prepped["wo"], prepped["wgu"], prepped["wd"])


# ---------------- pure-JAX reference (mirrors the torch module) ----------------
def reference(x, cos, sin, mask, params, *, num_heads, num_kv_heads, eps):
    B, S, H = x.shape
    d = H // num_heads
    hp = jax.lax.Precision.HIGHEST

    def rms(h, w):
        return h * jax.lax.rsqrt(jnp.mean(h * h, -1, keepdims=True) + eps) * w.reshape(-1)

    def rot(t):
        t1, t2 = jnp.split(t, 2, axis=-1)
        return jnp.concatenate([-t2, t1], axis=-1)

    res = x
    h = rms(x, params["w_in"])
    q = jnp.einsum('bsh,hd->bsd', h, params["wq"], precision=hp)
    k = jnp.einsum('bsh,hd->bsd', h, params["wk"], precision=hp)
    v = jnp.einsum('bsh,hd->bsd', h, params["wv"], precision=hp)
    q = q.reshape(B, S, num_heads, d).transpose(0, 2, 1, 3)
    k = k.reshape(B, S, num_kv_heads, d).transpose(0, 2, 1, 3)
    v = v.reshape(B, S, num_kv_heads, d).transpose(0, 2, 1, 3)
    c, s = cos[None, None], sin[None, None]
    q = q * c + rot(q) * s
    k = k * c + rot(k) * s
    rep = num_heads // num_kv_heads
    k = jnp.repeat(k, rep, axis=1)
    v = jnp.repeat(v, rep, axis=1)
    w = jnp.einsum('bhqd,bhkd->bhqk', q, k, precision=hp) / math.sqrt(d)
    w = w + mask[None, None]
    w = jax.nn.softmax(w, axis=-1)
    o = jnp.einsum('bhqk,bhkd->bhqd', w, v, precision=hp)
    o = o.transpose(0, 2, 1, 3).reshape(B, S, H)
    o = jnp.einsum('bsh,ho->bso', o, params["wo"], precision=hp)
    x1 = res + o
    h2 = rms(x1, params["w_post"])
    g = jnp.einsum('bsh,hi->bsi', h2, params["wg"], precision=hp)
    u = jnp.einsum('bsh,hi->bsi', h2, params["wu"], precision=hp)
    dn = jnp.einsum('bsi,ih->bsh', jax.nn.silu(g) * u, params["wd"], precision=hp)
    return x1 + dn


if __name__ == "__main__":
    # config: hidden=64, heads=4, kv_heads=2 (GQA), head_dim=16, intermediate=128
    B, S, H = 2, 8, 64
    NUM_HEADS, NUM_KV_HEADS = 4, 2
    HEAD_DIM = H // NUM_HEADS
    KVD = NUM_KV_HEADS * HEAD_DIM
    INTER = 128
    EPS = 1e-5

    key = jax.random.PRNGKey(0)
    ks = jax.random.split(key, 11)
    scale = 0.02
    params = {
        "w_in": 1.0 + 0.1 * jax.random.normal(ks[8], (1, H), jnp.float32),
        "w_post": 1.0 + 0.1 * jax.random.normal(ks[9], (1, H), jnp.float32),
        "wq": scale * jax.random.normal(ks[0], (H, H), jnp.float32),
        "wk": scale * jax.random.normal(ks[1], (H, KVD), jnp.float32),
        "wv": scale * jax.random.normal(ks[2], (H, KVD), jnp.float32),
        "wo": scale * jax.random.normal(ks[3], (H, H), jnp.float32),
        "wg": scale * jax.random.normal(ks[4], (H, INTER), jnp.float32),
        "wu": scale * jax.random.normal(ks[5], (H, INTER), jnp.float32),
        "wd": scale * jax.random.normal(ks[6], (INTER, H), jnp.float32),
    }
    x = jax.random.normal(ks[7], (B, S, H), jnp.float32)

    # rotary embeddings, shape (S, head_dim)
    inv_freq = 1.0 / (10000.0 ** (jnp.arange(0, HEAD_DIM, 2, dtype=jnp.float32) / HEAD_DIM))
    t = jnp.arange(S, dtype=jnp.float32)
    freqs = jnp.outer(t, inv_freq)
    emb = jnp.concatenate([freqs, freqs], axis=-1)
    cos, sin = jnp.cos(emb), jnp.sin(emb)

    # causal additive mask (reference only; kernel generates it on-chip)
    i = jnp.arange(S)[:, None]
    j = jnp.arange(S)[None, :]
    mask = jnp.where(j <= i, 0.0, -1e9).astype(jnp.float32)

    # one-time parameter / rope-table preparation (kept out of the per-step call)
    prepped = prepare_decoder_params(params)
    rope = prepare_rope(cos, sin, NUM_HEADS, NUM_KV_HEADS)

    out = decoder_layer(x, rope, prepped,
                        num_heads=NUM_HEADS, num_kv_heads=NUM_KV_HEADS,
                        eps=EPS, causal=True)
    out = jax.block_until_ready(out)

    ref = reference(x, cos, sin, mask, params,
                    num_heads=NUM_HEADS, num_kv_heads=NUM_KV_HEADS, eps=EPS)
    ref = jax.block_until_ready(ref)

    max_err = float(jnp.max(jnp.abs(out - ref)))
    # bf16 matmul operands + approx reciprocal vs. f32 HIGHEST reference
    if not (out.shape == (B, S, H) and max_err < 2e-2):
        raise AssertionError(f"mismatch: max_err={max_err}")

    print("KERNEL_OK")
</pallas_src>

<mosaic_0001>
module attributes {stable_mosaic.version = 11 : i64} {
  func.func @decoder_layer_kernel(%arg0: i32, %arg1: i32, %arg2: memref<1x8x64xf32, #tpu.memory_space<vmem>>, %arg3: memref<1x8x64xf32, #tpu.memory_space<vmem>>, %arg4: memref<8x64xf32, #tpu.memory_space<vmem>>, %arg5: memref<8x64xf32, #tpu.memory_space<vmem>>, %arg6: memref<8x64xf32, #tpu.memory_space<vmem>>, %arg7: memref<8x32xf32, #tpu.memory_space<vmem>>, %arg8: memref<8x32xf32, #tpu.memory_space<vmem>>, %arg9: memref<8x32xf32, #tpu.memory_space<vmem>>, %arg10: memref<1x64xf32, #tpu.memory_space<vmem>>, %arg11: memref<1x64xf32, #tpu.memory_space<vmem>>, %arg12: memref<64x64xbf16, #tpu.memory_space<vmem>>, %arg13: memref<64x64xbf16, #tpu.memory_space<vmem>>, %arg14: memref<64x64xbf16, #tpu.memory_space<vmem>>, %arg15: memref<64x256xbf16, #tpu.memory_space<vmem>>, %arg16: memref<128x64xbf16, #tpu.memory_space<vmem>>, %arg17: memref<1x8x64xf32, #tpu.memory_space<vmem>>, %arg18: memref<8x32xbf16, #tpu.memory_space<vmem>>, %arg19: memref<8x32xbf16, #tpu.memory_space<vmem>>) attributes {dimension_semantics = [#tpu.dimension_semantics<parallel>, #tpu.dimension_semantics<arbitrary>], iteration_bounds = array<i64: 2, 1>, scalar_prefetch = 0 : i64, scratch_operands = 2 : i64, tpu.core_type = #tpu.core_type<tc>, window_params = [{transform_indices = @transform_0, window_bounds = array<i64: 1, 8, 64>}, {transform_indices = @transform_1, window_bounds = array<i64: 1, 8, 64>}, {transform_indices = @transform_2, window_bounds = array<i64: 8, 64>}, {transform_indices = @transform_3, window_bounds = array<i64: 8, 64>}, {transform_indices = @transform_4, window_bounds = array<i64: 8, 64>}, {pipeline_mode = #tpu.pipeline_mode<synchronous>, transform_indices = @transform_5, window_bounds = array<i64: 8, 32>}, {pipeline_mode = #tpu.pipeline_mode<synchronous>, transform_indices = @transform_6, window_bounds = array<i64: 8, 32>}, {pipeline_mode = #tpu.pipeline_mode<synchronous>, transform_indices = @transform_7, window_bounds = array<i64: 8, 32>}, {pipeline_mode = #tpu.pipeline_mode<synchronous>, transform_indices = @transform_8, window_bounds = array<i64: 1, 64>}, {pipeline_mode = #tpu.pipeline_mode<synchronous>, transform_indices = @transform_9, window_bounds = array<i64: 1, 64>}, {pipeline_mode = #tpu.pipeline_mode<synchronous>, transform_indices = @transform_10, window_bounds = array<i64: 64, 64>}, {pipeline_mode = #tpu.pipeline_mode<synchronous>, transform_indices = @transform_11, window_bounds = array<i64: 64, 64>}, {pipeline_mode = #tpu.pipeline_mode<synchronous>, transform_indices = @transform_12, window_bounds = array<i64: 64, 64>}, {pipeline_mode = #tpu.pipeline_mode<synchronous>, transform_indices = @transform_13, window_bounds = array<i64: 64, 256>}, {pipeline_mode = #tpu.pipeline_mode<synchronous>, transform_indices = @transform_14, window_bounds = array<i64: 128, 64>}, {transform_indices = @transform_15, window_bounds = array<i64: 1, 8, 64>}]} {
    %c0_i32 = arith.constant 0 : i32
    %0 = arith.cmpi eq, %arg1, %c0_i32 : i32
    %1 = arith.extui %0 : i1 to i32
    %c0_i32_0 = arith.constant 0 : i32
    %2 = arith.cmpi ne, %1, %c0_i32_0 : i32
    scf.if %2 {
      %c0_56 = arith.constant 0 : index
      %c0_57 = arith.constant 0 : index
      %c0_58 = arith.constant 0 : index
      %156 = vector.load %arg3[%c0_56, %c0_57, %c0_58] : memref<1x8x64xf32, #tpu.memory_space<vmem>>, vector<1x8x64xf32>
      %157 = vector.shape_cast %156 : vector<1x8x64xf32> to vector<8x64xf32>
      %c0_59 = arith.constant 0 : index
      %c0_60 = arith.constant 0 : index
      %158 = vector.load %arg10[%c0_59, %c0_60] : memref<1x64xf32, #tpu.memory_space<vmem>>, vector<1x64xf32>
      %159 = vector.shape_cast %158 : vector<1x64xf32> to vector<64xf32>
      %160 = arith.mulf %157, %157 : vector<8x64xf32>
      %cst_61 = arith.constant dense<0.000000e+00> : vector<8xf32>
      %161 = vector.multi_reduction <add>, %160, %cst_61 [1] : vector<8x64xf32> to vector<8xf32>
      %162 = vector.shape_cast %161 : vector<8xf32> to vector<8x1xf32>
      %cst_62 = arith.constant 6.400000e+01 : f32
      %163 = vector.broadcast %cst_62 : f32 to vector<8x1xf32>
      %164 = arith.divf %162, %163 : vector<8x1xf32>
      %cst_63 = arith.constant 9.99999974E-6 : f32
      %165 = vector.broadcast %cst_63 : f32 to vector<8x1xf32>
      %166 = arith.addf %164, %165 : vector<8x1xf32>
      %167 = math.rsqrt %166 : vector<8x1xf32>
      %168 = vector.broadcast %167 : vector<8x1xf32> to vector<8x64xf32>
      %169 = arith.mulf %157, %168 : vector<8x64xf32>
      %170 = vector.shape_cast %159 : vector<64xf32> to vector<1x64xf32>
      %171 = vector.broadcast %170 : vector<1x64xf32> to vector<8x64xf32>
      %172 = arith.mulf %169, %171 : vector<8x64xf32>
      %173 = arith.truncf %172 : vector<8x64xf32> to vector<8x64xbf16>
      %c0_64 = arith.constant 0 : index
      %c0_65 = arith.constant 0 : index
      %174 = vector.load %arg13[%c0_64, %c0_65] : memref<64x64xbf16, #tpu.memory_space<vmem>>, vector<64x64xbf16>
      %cst_66 = arith.constant dense<0.000000e+00> : vector<8x64xf32>
      %175 = tpu.matmul %173, %174, %cst_66 {dimension_numbers = #tpu.dot_dimension_numbers<[1], [0], [0], [1], [0, 0, 1, 1], [], []>} : vector<8x64xbf16>, vector<64x64xbf16>, vector<8x64xf32> -> vector<8x64xf32>
      %176 = vector.extract_strided_slice %175 {offsets = [0, 0], sizes = [8, 32], strides = [1, 1]} : vector<8x64xf32> to vector<8x32xf32>
      %177 = vector.extract_strided_slice %175 {offsets = [0, 32], sizes = [8, 32], strides = [1, 1]} : vector<8x64xf32> to vector<8x32xf32>
      %178 = vector.extract_strided_slice %176 {offsets = [0, 8], sizes = [8, 24], strides = [1, 1]} : vector<8x32xf32> to vector<8x24xf32>
      %179 = vector.extract_strided_slice %176 {offsets = [0, 0], sizes = [8, 8], strides = [1, 1]} : vector<8x32xf32> to vector<8x8xf32>
      %180 = tpu.concatenate %178, %179 in 1 : vector<8x24xf32>, vector<8x8xf32> -> vector<8x32xf32>
      %181 = vector.extract_strided_slice %176 {offsets = [0, 24], sizes = [8, 8], strides = [1, 1]} : vector<8x32xf32> to vector<8x8xf32>
      %182 = vector.extract_strided_slice %176 {offsets = [0, 0], sizes = [8, 24], strides = [1, 1]} : vector<8x32xf32> to vector<8x24xf32>
      %183 = tpu.concatenate %181, %182 in 1 : vector<8x8xf32>, vector<8x24xf32> -> vector<8x32xf32>
      %c0_67 = arith.constant 0 : index
      %c0_68 = arith.constant 0 : index
      %184 = vector.load %arg7[%c0_67, %c0_68] : memref<8x32xf32, #tpu.memory_space<vmem>>, vector<8x32xf32>
      %185 = arith.mulf %176, %184 : vector<8x32xf32>
      %c0_69 = arith.constant 0 : index
      %c0_70 = arith.constant 0 : index
      %186 = vector.load %arg8[%c0_69, %c0_70] : memref<8x32xf32, #tpu.memory_space<vmem>>, vector<8x32xf32>
      %187 = arith.mulf %180, %186 : vector<8x32xf32>
      %188 = arith.addf %185, %187 : vector<8x32xf32>
      %c0_71 = arith.constant 0 : index
      %c0_72 = arith.constant 0 : index
      %189 = vector.load %arg9[%c0_71, %c0_72] : memref<8x32xf32, #tpu.memory_space<vmem>>, vector<8x32xf32>
      %190 = arith.mulf %183, %189 : vector<8x32xf32>
      %191 = arith.addf %188, %190 : vector<8x32xf32>
      %192 = arith.truncf %191 : vector<8x32xf32> to vector<8x32xbf16>
      %c0_73 = arith.constant 0 : index
      %c0_74 = arith.constant 0 : index
      %193 = vector.load %arg18[%c0_73, %c0_74] : memref<8x32xbf16, #tpu.memory_space<vmem>>, vector<8x32xbf16>
      tpu.vector_store %arg18[%c0_73, %c0_74], %192 {strides = array<i32>} : memref<8x32xbf16, #tpu.memory_space<vmem>>, vector<8x32xbf16>,
      %194 = arith.truncf %177 : vector<8x32xf32> to vector<8x32xbf16>
      %c0_75 = arith.constant 0 : index
      %c0_76 = arith.constant 0 : index
      %195 = vector.load %arg19[%c0_75, %c0_76] : memref<8x32xbf16, #tpu.memory_space<vmem>>, vector<8x32xbf16>
      tpu.vector_store %arg19[%c0_75, %c0_76], %194 {strides = array<i32>} : memref<8x32xbf16, #tpu.memory_space<vmem>>, vector<8x32xbf16>,
    } else {
    }
    %c0 = arith.constant 0 : index
    %c0_1 = arith.constant 0 : index
    %c0_2 = arith.constant 0 : index
    %3 = vector.load %arg2[%c0, %c0_1, %c0_2] : memref<1x8x64xf32, #tpu.memory_space<vmem>>, vector<1x8x64xf32>
    %4 = vector.shape_cast %3 : vector<1x8x64xf32> to vector<8x64xf32>
    %c0_3 = arith.constant 0 : index
    %c0_4 = arith.constant 0 : index
    %5 = vector.load %arg10[%c0_3, %c0_4] : memref<1x64xf32, #tpu.memory_space<vmem>>, vector<1x64xf32>
    %6 = vector.shape_cast %5 : vector<1x64xf32> to vector<64xf32>
    %7 = arith.mulf %4, %4 : vector<8x64xf32>
    %cst = arith.constant dense<0.000000e+00> : vector<8xf32>
    %8 = vector.multi_reduction <add>, %7, %cst [1] : vector<8x64xf32> to vector<8xf32>
    %9 = vector.shape_cast %8 : vector<8xf32> to vector<8x1xf32>
    %cst_5 = arith.constant 6.400000e+01 : f32
    %10 = vector.broadcast %cst_5 : f32 to vector<8x1xf32>
    %11 = arith.divf %9, %10 : vector<8x1xf32>
    %cst_6 = arith.constant 9.99999974E-6 : f32
    %12 = vector.broadcast %cst_6 : f32 to vector<8x1xf32>
    %13 = arith.addf %11, %12 : vector<8x1xf32>
    %14 = math.rsqrt %13 : vector<8x1xf32>
    %15 = vector.broadcast %14 : vector<8x1xf32> to vector<8x64xf32>
    %16 = arith.mulf %4, %15 : vector<8x64xf32>
    %17 = vector.shape_cast %6 : vector<64xf32> to vector<1x64xf32>
    %18 = vector.broadcast %17 : vector<1x64xf32> to vector<8x64xf32>
    %19 = arith.mulf %16, %18 : vector<8x64xf32>
    %20 = arith.truncf %19 : vector<8x64xf32> to vector<8x64xbf16>
    %c0_7 = arith.constant 0 : index
    %c0_8 = arith.constant 0 : index
    %21 = vector.load %arg12[%c0_7, %c0_8] : memref<64x64xbf16, #tpu.memory_space<vmem>>, vector<64x64xbf16>
    %cst_9 = arith.constant dense<0.000000e+00> : vector<8x64xf32>
    %22 = tpu.matmul %20, %21, %cst_9 {dimension_numbers = #tpu.dot_dimension_numbers<[1], [0], [0], [1], [0, 0, 1, 1], [], []>} : vector<8x64xbf16>, vector<64x64xbf16>, vector<8x64xf32> -> vector<8x64xf32>
    %23 = vector.extract_strided_slice %22 {offsets = [0, 8], sizes = [8, 56], strides = [1, 1]} : vector<8x64xf32> to vector<8x56xf32>
    %24 = vector.extract_strided_slice %22 {offsets = [0, 0], sizes = [8, 8], strides = [1, 1]} : vector<8x64xf32> to vector<8x8xf32>
    %25 = tpu.concatenate %23, %24 in 1 : vector<8x56xf32>, vector<8x8xf32> -> vector<8x64xf32>
    %26 = vector.extract_strided_slice %22 {offsets = [0, 56], sizes = [8, 8], strides = [1, 1]} : vector<8x64xf32> to vector<8x8xf32>
    %27 = vector.extract_strided_slice %22 {offsets = [0, 0], sizes = [8, 56], strides = [1, 1]} : vector<8x64xf32> to vector<8x56xf32>
    %28 = tpu.concatenate %26, %27 in 1 : vector<8x8xf32>, vector<8x56xf32> -> vector<8x64xf32>
    %c0_10 = arith.constant 0 : index
    %c0_11 = arith.constant 0 : index
    %29 = vector.load %arg4[%c0_10, %c0_11] : memref<8x64xf32, #tpu.memory_space<vmem>>, vector<8x64xf32>
    %30 = arith.mulf %22, %29 : vector<8x64xf32>
    %c0_12 = arith.constant 0 : index
    %c0_13 = arith.constant 0 : index
    %31 = vector.load %arg5[%c0_12, %c0_13] : memref<8x64xf32, #tpu.memory_space<vmem>>, vector<8x64xf32>
    %32 = arith.mulf %25, %31 : vector<8x64xf32>
    %33 = arith.addf %30, %32 : vector<8x64xf32>
    %c0_14 = arith.constant 0 : index
    %c0_15 = arith.constant 0 : index
    %34 = vector.load %arg6[%c0_14, %c0_15] : memref<8x64xf32, #tpu.memory_space<vmem>>, vector<8x64xf32>
    %35 = arith.mulf %28, %34 : vector<8x64xf32>
    %36 = arith.addf %33, %35 : vector<8x64xf32>
    %cst_16 = arith.constant 2.500000e-01 : f32
    %37 = vector.broadcast %cst_16 : f32 to vector<8x64xf32>
    %38 = arith.mulf %36, %37 : vector<8x64xf32>
    %c0_17 = arith.constant 0 : index
    %c0_18 = arith.constant 0 : index
    %39 = vector.load %arg18[%c0_17, %c0_18] : memref<8x32xbf16, #tpu.memory_space<vmem>>, vector<8x32xbf16>
    %c0_19 = arith.constant 0 : index
    %c0_20 = arith.constant 0 : index
    %40 = vector.load %arg19[%c0_19, %c0_20] : memref<8x32xbf16, #tpu.memory_space<vmem>>, vector<8x32xbf16>
    %c0_21 = arith.constant 0 : index
    %c0_22 = arith.constant 0 : index
    %41 = vector.load %arg14[%c0_21, %c0_22] : memref<64x64xbf16, #tpu.memory_space<vmem>>, vector<64x64xbf16>
    %42 = tpu.iota {dimensions = array<i32: 0>} : vector<16x8xi32>
    %43 = tpu.iota {dimensions = array<i32: 1>} : vector<16x8xi32>
    %c8_i32 = arith.constant 8 : i32
    %44 = arith.muli %arg1, %c8_i32 : i32
    %c8_i32_23 = arith.constant 8 : i32
    %c0_i32_24 = arith.constant 0 : i32
    %45 = arith.cmpi eq, %c8_i32_23, %c0_i32_24 : i32
    %c1_i32 = arith.constant 1 : i32
    %46 = arith.select %45, %c1_i32, %c8_i32_23 : i32
    %47 = vector.broadcast %46 : i32 to vector<16x8xi32>
    %48 = arith.remsi %42, %47 : vector<16x8xi32>
    %c0_i32_25 = arith.constant 0 : i32
    %49 = vector.broadcast %c0_i32_25 : i32 to vector<16x8xi32>
    %50 = arith.cmpi ne, %48, %49 : vector<16x8xi32>
    %c0_i32_26 = arith.constant 0 : i32
    %51 = vector.broadcast %c0_i32_26 : i32 to vector<16x8xi32>
    %52 = arith.cmpi slt, %48, %51 : vector<16x8xi32>
    %c0_i32_27 = arith.constant 0 : i32
    %53 = arith.cmpi slt, %46, %c0_i32_27 : i32
    %54 = vector.broadcast %53 : i1 to vector<16x8xi1>
    %55 = vector.broadcast %54 : vector<16x8xi1> to vector<16x8xi1>
    %56 = arith.xori %52, %55 : vector<16x8xi1>
    %57 = arith.andi %56, %50 : vector<16x8xi1>
    %58 = vector.broadcast %46 : i32 to vector<16x8xi32>
    %59 = arith.addi %48, %58 : vector<16x8xi32>
    %60 = arith.select %57, %59, %48 : vector<16x8xi1>, vector<16x8xi32>
    %61 = vector.broadcast %44 : i32 to vector<16x8xi32>
    %62 = arith.addi %61, %60 : vector<16x8xi32>
    %63 = arith.cmpi sle, %43, %62 : vector<16x8xi32>
    %cst_28 = arith.constant 0.000000e+00 : f32
    %64 = vector.broadcast %cst_28 : f32 to vector<8x64xf32>
    %65 = vector.extract_strided_slice %39 {offsets = [0, 0], sizes = [8, 16], strides = [1, 1]} : vector<8x32xbf16> to vector<8x16xbf16>
    %66 = vector.extract_strided_slice %40 {offsets = [0, 0], sizes = [8, 16], strides = [1, 1]} : vector<8x32xbf16> to vector<8x16xbf16>
    %67 = vector.extract_strided_slice %38 {offsets = [0, 0], sizes = [8, 16], strides = [1, 1]} : vector<8x64xf32> to vector<8x16xf32>
    %68 = vector.extract_strided_slice %38 {offsets = [0, 16], sizes = [8, 16], strides = [1, 1]} : vector<8x64xf32> to vector<8x16xf32>
    %69 = tpu.concatenate %67, %68 in 0 : vector<8x16xf32>, vector<8x16xf32> -> vector<16x16xf32>
    %70 = arith.truncf %69 : vector<16x16xf32> to vector<16x16xbf16>
    %cst_29 = arith.constant dense<0.000000e+00> : vector<16x8xf32>
    %71 = tpu.matmul %70, %65, %cst_29 {dimension_numbers = #tpu.dot_dimension_numbers<[1], [1], [0], [0], [0, 0, 1, 0], [], []>} : vector<16x16xbf16>, vector<8x16xbf16>, vector<16x8xf32> -> vector<16x8xf32>
    %cst_30 = arith.constant -1.000000e+09 : f32
    %72 = vector.broadcast %cst_30 : f32 to vector<16x8xf32>
    %73 = arith.select %63, %71, %72 : vector<16x8xi1>, vector<16x8xf32>
    %cst_31 = arith.constant dense<0xFF800000> : vector<16xf32>
    %74 = vector.multi_reduction <maximumf>, %73, %cst_31 [1] : vector<16x8xf32> to vector<16xf32>
    %75 = vector.shape_cast %74 : vector<16xf32> to vector<16x1xf32>
    %76 = vector.broadcast %75 : vector<16x1xf32> to vector<16x8xf32>
    %77 = arith.subf %73, %76 : vector<16x8xf32>
    %78 = math.exp %77 : vector<16x8xf32>
    %cst_32 = arith.constant dense<0.000000e+00> : vector<16xf32>
    %79 = vector.multi_reduction <add>, %78, %cst_32 [1] : vector<16x8xf32> to vector<16xf32>
    %80 = vector.shape_cast %79 : vector<16xf32> to vector<16x1xf32>
    %81 = tpu.reciprocal %80 {approx = true} : vector<16x1xf32> -> vector<16x1xf32>
    %82 = vector.broadcast %81 : vector<16x1xf32> to vector<16x8xf32>
    %83 = arith.mulf %78, %82 : vector<16x8xf32>
    %84 = arith.truncf %83 : vector<16x8xf32> to vector<16x8xbf16>
    %cst_33 = arith.constant dense<0.000000e+00> : vector<16x16xf32>
    %85 = tpu.matmul %84, %66, %cst_33 {dimension_numbers = #tpu.dot_dimension_numbers<[1], [0], [0], [1], [0, 0, 1, 1], [], []>} : vector<16x8xbf16>, vector<8x16xbf16>, vector<16x16xf32> -> vector<16x16xf32>
    %86 = vector.extract_strided_slice %85 {offsets = [0, 0], sizes = [8, 16], strides = [1, 1]} : vector<16x16xf32> to vector<8x16xf32>
    %87 = vector.extract_strided_slice %85 {offsets = [8, 0], sizes = [8, 16], strides = [1, 1]} : vector<16x16xf32> to vector<8x16xf32>
    %88 = tpu.concatenate %86, %87 in 1 : vector<8x16xf32>, vector<8x16xf32> -> vector<8x32xf32>
    %89 = arith.truncf %88 : vector<8x32xf32> to vector<8x32xbf16>
    %90 = vector.extract_strided_slice %41 {offsets = [0, 0], sizes = [32, 64], strides = [1, 1]} : vector<64x64xbf16> to vector<32x64xbf16>
    %cst_34 = arith.constant dense<0.000000e+00> : vector<8x64xf32>
    %91 = tpu.matmul %89, %90, %cst_34 {dimension_numbers = #tpu.dot_dimension_numbers<[1], [0], [0], [1], [0, 0, 1, 1], [], []>} : vector<8x32xbf16>, vector<32x64xbf16>, vector<8x64xf32> -> vector<8x64xf32>
    %92 = arith.addf %64, %91 : vector<8x64xf32>
    %93 = vector.extract_strided_slice %39 {offsets = [0, 16], sizes = [8, 16], strides = [1, 1]} : vector<8x32xbf16> to vector<8x16xbf16>
    %94 = vector.extract_strided_slice %40 {offsets = [0, 16], sizes = [8, 16], strides = [1, 1]} : vector<8x32xbf16> to vector<8x16xbf16>
    %95 = vector.extract_strided_slice %38 {offsets = [0, 32], sizes = [8, 16], strides = [1, 1]} : vector<8x64xf32> to vector<8x16xf32>
    %96 = vector.extract_strided_slice %38 {offsets = [0, 48], sizes = [8, 16], strides = [1, 1]} : vector<8x64xf32> to vector<8x16xf32>
    %97 = tpu.concatenate %95, %96 in 0 : vector<8x16xf32>, vector<8x16xf32> -> vector<16x16xf32>
    %98 = arith.truncf %97 : vector<16x16xf32> to vector<16x16xbf16>
    %cst_35 = arith.constant dense<0.000000e+00> : vector<16x8xf32>
    %99 = tpu.matmul %98, %93, %cst_35 {dimension_numbers = #tpu.dot_dimension_numbers<[1], [1], [0], [0], [0, 0, 1, 0], [], []>} : vector<16x16xbf16>, vector<8x16xbf16>, vector<16x8xf32> -> vector<16x8xf32>
    %cst_36 = arith.constant -1.000000e+09 : f32
    %100 = vector.broadcast %cst_36 : f32 to vector<16x8xf32>
    %101 = arith.select %63, %99, %100 : vector<16x8xi1>, vector<16x8xf32>
    %cst_37 = arith.constant dense<0xFF800000> : vector<16xf32>
    %102 = vector.multi_reduction <maximumf>, %101, %cst_37 [1] : vector<16x8xf32> to vector<16xf32>
    %103 = vector.shape_cast %102 : vector<16xf32> to vector<16x1xf32>
    %104 = vector.broadcast %103 : vector<16x1xf32> to vector<16x8xf32>
    %105 = arith.subf %101, %104 : vector<16x8xf32>
    %106 = math.exp %105 : vector<16x8xf32>
    %cst_38 = arith.constant dense<0.000000e+00> : vector<16xf32>
    %107 = vector.multi_reduction <add>, %106, %cst_38 [1] : vector<16x8xf32> to vector<16xf32>
    %108 = vector.shape_cast %107 : vector<16xf32> to vector<16x1xf32>
    %109 = tpu.reciprocal %108 {approx = true} : vector<16x1xf32> -> vector<16x1xf32>
    %110 = vector.broadcast %109 : vector<16x1xf32> to vector<16x8xf32>
    %111 = arith.mulf %106, %110 : vector<16x8xf32>
    %112 = arith.truncf %111 : vector<16x8xf32> to vector<16x8xbf16>
    %cst_39 = arith.constant dense<0.000000e+00> : vector<16x16xf32>
    %113 = tpu.matmul %112, %94, %cst_39 {dimension_numbers = #tpu.dot_dimension_numbers<[1], [0], [0], [1], [0, 0, 1, 1], [], []>} : vector<16x8xbf16>, vector<8x16xbf16>, vector<16x16xf32> -> vector<16x16xf32>
    %114 = vector.extract_strided_slice %113 {offsets = [0, 0], sizes = [8, 16], strides = [1, 1]} : vector<16x16xf32> to vector<8x16xf32>
    %115 = vector.extract_strided_slice %113 {offsets = [8, 0], sizes = [8, 16], strides = [1, 1]} : vector<16x16xf32> to vector<8x16xf32>
    %116 = tpu.concatenate %114, %115 in 1 : vector<8x16xf32>, vector<8x16xf32> -> vector<8x32xf32>
    %117 = arith.truncf %116 : vector<8x32xf32> to vector<8x32xbf16>
    %118 = vector.extract_strided_slice %41 {offsets = [32, 0], sizes = [32, 64], strides = [1, 1]} : vector<64x64xbf16> to vector<32x64xbf16>
    %cst_40 = arith.constant dense<0.000000e+00> : vector<8x64xf32>
    %119 = tpu.matmul %117, %118, %cst_40 {dimension_numbers = #tpu.dot_dimension_numbers<[1], [0], [0], [1], [0, 0, 1, 1], [], []>} : vector<8x32xbf16>, vector<32x64xbf16>, vector<8x64xf32> -> vector<8x64xf32>
    %120 = arith.addf %92, %119 : vector<8x64xf32>
    %121 = arith.addf %4, %120 : vector<8x64xf32>
    %c0_41 = arith.constant 0 : index
    %c0_42 = arith.constant 0 : index
    %122 = vector.load %arg11[%c0_41, %c0_42] : memref<1x64xf32, #tpu.memory_space<vmem>>, vector<1x64xf32>
    %123 = vector.shape_cast %122 : vector<1x64xf32> to vector<64xf32>
    %124 = arith.mulf %121, %121 : vector<8x64xf32>
    %cst_43 = arith.constant dense<0.000000e+00> : vector<8xf32>
    %125 = vector.multi_reduction <add>, %124, %cst_43 [1] : vector<8x64xf32> to vector<8xf32>
    %126 = vector.shape_cast %125 : vector<8xf32> to vector<8x1xf32>
    %cst_44 = arith.constant 6.400000e+01 : f32
    %127 = vector.broadcast %cst_44 : f32 to vector<8x1xf32>
    %128 = arith.divf %126, %127 : vector<8x1xf32>
    %cst_45 = arith.constant 9.99999974E-6 : f32
    %129 = vector.broadcast %cst_45 : f32 to vector<8x1xf32>
    %130 = arith.addf %128, %129 : vector<8x1xf32>
    %131 = math.rsqrt %130 : vector<8x1xf32>
    %132 = vector.broadcast %131 : vector<8x1xf32> to vector<8x64xf32>
    %133 = arith.mulf %121, %132 : vector<8x64xf32>
    %134 = vector.shape_cast %123 : vector<64xf32> to vector<1x64xf32>
    %135 = vector.broadcast %134 : vector<1x64xf32> to vector<8x64xf32>
    %136 = arith.mulf %133, %135 : vector<8x64xf32>
    %137 = arith.truncf %136 : vector<8x64xf32> to vector<8x64xbf16>
    %c0_46 = arith.constant 0 : index
    %c0_47 = arith.constant 0 : index
    %138 = vector.load %arg15[%c0_46, %c0_47] : memref<64x256xbf16, #tpu.memory_space<vmem>>, vector<64x256xbf16>
    %cst_48 = arith.constant dense<0.000000e+00> : vector<8x256xf32>
    %139 = tpu.matmul %137, %138, %cst_48 {dimension_numbers = #tpu.dot_dimension_numbers<[1], [0], [0], [1], [0, 0, 1, 1], [], []>} : vector<8x64xbf16>, vector<64x256xbf16>, vector<8x256xf32> -> vector<8x256xf32>
    %140 = vector.extract_strided_slice %139 {offsets = [0, 0], sizes = [8, 128], strides = [1, 1]} : vector<8x256xf32> to vector<8x128xf32>
    %141 = vector.extract_strided_slice %139 {offsets = [0, 128], sizes = [8, 128], strides = [1, 1]} : vector<8x256xf32> to vector<8x128xf32>
    %142 = arith.negf %140 : vector<8x128xf32>
    %143 = math.exp %142 : vector<8x128xf32>
    %cst_49 = arith.constant 1.000000e+00 : f32
    %144 = vector.broadcast %cst_49 : f32 to vector<8x128xf32>
    %145 = arith.addf %144, %143 : vector<8x128xf32>
    %146 = arith.divf %144, %145 : vector<8x128xf32>
    %147 = arith.mulf %140, %146 : vector<8x128xf32>
    %148 = arith.mulf %147, %141 : vector<8x128xf32>
    %149 = arith.truncf %148 : vector<8x128xf32> to vector<8x128xbf16>
    %c0_50 = arith.constant 0 : index
    %c0_51 = arith.constant 0 : index
    %150 = vector.load %arg16[%c0_50, %c0_51] : memref<128x64xbf16, #tpu.memory_space<vmem>>, vector<128x64xbf16>
    %cst_52 = arith.constant dense<0.000000e+00> : vector<8x64xf32>
    %151 = tpu.matmul %149, %150, %cst_52 {dimension_numbers = #tpu.dot_dimension_numbers<[1], [0], [0], [1], [0, 0, 1, 1], [], []>} : vector<8x128xbf16>, vector<128x64xbf16>, vector<8x64xf32> -> vector<8x64xf32>
    %152 = arith.addf %121, %151 : vector<8x64xf32>
    %c0_53 = arith.constant 0 : index
    %c0_54 = arith.constant 0 : index
    %c0_55 = arith.constant 0 : index
    %153 = vector.load %arg17[%c0_53, %c0_54, %c0_55] : memref<1x8x64xf32, #tpu.memory_space<vmem>>, vector<1x8x64xf32>
    %154 = vector.shape_cast %153 : vector<1x8x64xf32> to vector<8x64xf32>
    %155 = vector.shape_cast %152 : vector<8x64xf32> to vector<1x8x64xf32>
    tpu.vector_store %arg17[%c0_53, %c0_54, %c0_55], %155 {strides = array<i32>} : memref<1x8x64xf32, #tpu.memory_space<vmem>>, vector<1x8x64xf32>,
    return
  }
  func.func @transform_0(%arg0: i32, %arg1: i32) -> (i32, i32, i32) {
    %c0_i32 = arith.constant 0 : i32
    %c0_i32_0 = arith.constant 0 : i32
    return %arg0, %arg1, %c0_i32 : i32, i32, i32
  }
  func.func @transform_1(%arg0: i32, %arg1: i32) -> (i32, i32, i32) {
    %c0_i32 = arith.constant 0 : i32
    %c0_i32_0 = arith.constant 0 : i32
    %c0_i32_1 = arith.constant 0 : i32
    return %arg0, %c0_i32, %c0_i32_0 : i32, i32, i32
  }
  func.func @transform_2(%arg0: i32, %arg1: i32) -> (i32, i32) {
    %c0_i32 = arith.constant 0 : i32
    %c0_i32_0 = arith.constant 0 : i32
    return %arg1, %c0_i32 : i32, i32
  }
  func.func @transform_3(%arg0: i32, %arg1: i32) -> (i32, i32) {
    %c0_i32 = arith.constant 0 : i32
    %c0_i32_0 = arith.constant 0 : i32
    return %arg1, %c0_i32 : i32, i32
  }
  func.func @transform_4(%arg0: i32, %arg1: i32) -> (i32, i32) {
    %c0_i32 = arith.constant 0 : i32
    %c0_i32_0 = arith.constant 0 : i32
    return %arg1, %c0_i32 : i32, i32
  }
  func.func @transform_5(%arg0: i32, %arg1: i32) -> (i32, i32) {
    %c0_i32 = arith.constant 0 : i32
    %c0_i32_0 = arith.constant 0 : i32
    %c0_i32_1 = arith.constant 0 : i32
    return %c0_i32, %c0_i32_0 : i32, i32
  }
  func.func @transform_6(%arg0: i32, %arg1: i32) -> (i32, i32) {
    %c0_i32 = arith.constant 0 : i32
    %c0_i32_0 = arith.constant 0 : i32
    %c0_i32_1 = arith.constant 0 : i32
    return %c0_i32, %c0_i32_0 : i32, i32
  }
  func.func @transform_7(%arg0: i32, %arg1: i32) -> (i32, i32) {
    %c0_i32 = arith.constant 0 : i32
    %c0_i32_0 = arith.constant 0 : i32
    %c0_i32_1 = arith.constant 0 : i32
    return %c0_i32, %c0_i32_0 : i32, i32
  }
  func.func @transform_8(%arg0: i32, %arg1: i32) -> (i32, i32) {
    %c0_i32 = arith.constant 0 : i32
    %c0_i32_0 = arith.constant 0 : i32
    %c0_i32_1 = arith.constant 0 : i32
    return %c0_i32, %c0_i32_0 : i32, i32
  }
  func.func @transform_9(%arg0: i32, %arg1: i32) -> (i32, i32) {
    %c0_i32 = arith.constant 0 : i32
    %c0_i32_0 = arith.constant 0 : i32
    %c0_i32_1 = arith.constant 0 : i32
    return %c0_i32, %c0_i32_0 : i32, i32
  }
  func.func @transform_10(%arg0: i32, %arg1: i32) -> (i32, i32) {
    %c0_i32 = arith.constant 0 : i32
    %c0_i32_0 = arith.constant 0 : i32
    %c0_i32_1 = arith.constant 0 : i32
    return %c0_i32, %c0_i32_0 : i32, i32
  }
  func.func @transform_11(%arg0: i32, %arg1: i32) -> (i32, i32) {
    %c0_i32 = arith.constant 0 : i32
    %c0_i32_0 = arith.constant 0 : i32
    %c0_i32_1 = arith.constant 0 : i32
    return %c0_i32, %c0_i32_0 : i32, i32
  }
  func.func @transform_12(%arg0: i32, %arg1: i32) -> (i32, i32) {
    %c0_i32 = arith.constant 0 : i32
    %c0_i32_0 = arith.constant 0 : i32
    %c0_i32_1 = arith.constant 0 : i32
    return %c0_i32, %c0_i32_0 : i32, i32
  }
  func.func @transform_13(%arg0: i32, %arg1: i32) -> (i32, i32) {
    %c0_i32 = arith.constant 0 : i32
    %c0_i32_0 = arith.constant 0 : i32
    %c0_i32_1 = arith.constant 0 : i32
    return %c0_i32, %c0_i32_0 : i32, i32
  }
  func.func @transform_14(%arg0: i32, %arg1: i32) -> (i32, i32) {
    %c0_i32 = arith.constant 0 : i32
    %c0_i32_0 = arith.constant 0 : i32
    %c0_i32_1 = arith.constant 0 : i32
    return %c0_i32, %c0_i32_0 : i32, i32
  }
  func.func @transform_15(%arg0: i32, %arg1: i32) -> (i32, i32, i32) {
    %c0_i32 = arith.constant 0 : i32
    %c0_i32_0 = arith.constant 0 : i32
    return %arg0, %arg1, %c0_i32 : i32, i32, i32
  }
}

</mosaic_0001>

<bundles_post_ra>
// kernel: tpu_custom_call.1
= control target key start
LH: loop header
LB: loop body
LE: loop exit
PB: predicated region body
PF: predicated region fallthrough
CT: control target
= control target key end

     0   :  { %s3073_s0 = inlined_call_operand.vmem [shape: f32[2,8,64], index: 0, kind: input, shape index: {}]   ;;  %s3074_s1 = inlined_call_operand.hbm [shape: f32[2,8,64], index: 1, kind: input, shape index: {}]   ;;  %s3075_s2 = inlined_call_operand.hbm [shape: f32[8,64], index: 2, kind: input, shape index: {}]   ;;  %s3076_s3 = inlined_call_operand.hbm [shape: f32[8,64], index: 3, kind: input, shape index: {}]   ;;  %s3077_s4 = inlined_call_operand.hbm [shape: f32[8,64], index: 4, kind: input, shape index: {}]   ;;  %s3078_s5 = inlined_call_operand.hbm [shape: f32[8,32], index: 5, kind: input, shape index: {}]   ;;  %s3079_s6 = inlined_call_operand.hbm [shape: f32[8,32], index: 6, kind: input, shape index: {}]   ;;  %s3080_s7 = inlined_call_operand.hbm [shape: f32[8,32], index: 7, kind: input, shape index: {}]   ;;  %s3081_s8 = inlined_call_operand.vmem [shape: f32[1,64], index: 8, kind: input, shape index: {}]   ;;  %s3082_s9 = inlined_call_operand.vmem [shape: f32[1,64], index: 9, kind: input, shape index: {}]   ;;  %s3083_s10 = inlined_call_operand.vmem [shape: bf16[64,64], index: 10, kind: input, shape index: {}]   ;;  %s3084_s11 = inlined_call_operand.hbm [shape: bf16[64,64], index: 11, kind: input, shape index: {}]   ;;  %s3085_s12 = inlined_call_operand.hbm [shape: bf16[64,64], index: 12, kind: input, shape index: {}]   ;;  %s3086_s13 = inlined_call_operand.vmem [shape: bf16[64,256], index: 13, kind: input, shape index: {}]   ;;  %s3087_s14 = inlined_call_operand.vmem [shape: bf16[128,64], index: 14, kind: input, shape index: {}]   ;;  %s3088_s15 = inlined_call_operand.hbm [shape: f32[2,8,64], index: 15, kind: output, shape index: {}]  }
   0x1   :  { %3097 = sst [smem:[#allocation27_spill]] %s3075_s2 }
   0x2   :  { %3098 = sst [smem:[#allocation28_spill]] %s3076_s3 }
   0x3   :  { %3099 = sst [smem:[#allocation29_spill]] %s3077_s4 }
   0x4   :  { %3100 = sst [smem:[#allocation30_spill]] %s3078_s5 }
   0x5   :  { %3101 = sst [smem:[#allocation31_spill]] %s3079_s6 }
   0x6   :  { %3102 = sst [smem:[#allocation32_spill]] %s3080_s7 }
   0x7   :  { %3103 = sst [smem:[#allocation33_spill]] %s3082_s9 }
   0x8   :  { %3104 = sst [smem:[#allocation34_spill]] %s3084_s11 }
   0x9   :  { %3105 = sst [smem:[#allocation35_spill]] %s3085_s12 }
   0xa   :  { %3106 = sst [smem:[#allocation36_spill]] %s3087_s14 }
   0xb   :  { %3107 = sst [smem:[#allocation37_spill]] %s3088_s15 }
   0xc   :  { %20 = vsyncpa [#allocation5], 0 }
   0xd   :  { %22 = vsyncpa [#allocation5 + $0x1], 0 }
   0xe   :  { %23 = vsyncpa [#allocation8], 0 }
   0xf   :  { %24 = vsyncpa [#allocation11], 0 }
  0x10   :  { %25 = vsyncpa [#allocation14], 0 }
  0x11   :  { %26 = vsyncpa [#allocation17], 0 }
  0x12   :  { %27 = vsyncpa [#allocation6], 0 }
  0x13   :  { %29 = vsyncpa [#allocation6 + $0x1], 0  ;;  %s2627_s18 = smov 0   ;;  %s2629_s19 = smov 0  }
  0x14   :  { %s2631_s20 = smov 0   ;;  %s2633_s21 = smov 0  }
  0x15   :  { %s2635_s22 = smov 0   ;;  %s2637_s23 = smov 0  }
  0x16 LB: > { %s3089_s24 = sadd.s32 4294967295, %s2521_s23   ;;  %p1778_p0 = scmp.ge.s32.totalorder %s2521_s23, 1  ;;  %s2521_s23 = sphi %s2637_s23, %s35_s23   ;;  %s2517_s22 = sphi %s2635_s22, %s3144_s22   ;;  %s2513_s21 = sphi %s2633_s21, %s3143_s21   ;;  %s2509_s20 = sphi %s2631_s20, %s3142_s20   ;;  %s2505_s19 = sphi %s2629_s19, %s3141_s19   ;;  %s2501_s18 = sphi %s2627_s18, %s3140_s18  }
  0x17   : > { %p2661_p1 = scmp.eq.s32.totalorder %s3089_s24, 0  ;;  %p422_p2 = scmp.lt.s32.totalorder %s2521_s23, 3 }
  0x18   : > { %s2523_s27 = smov [#allocation7]   ;;  %s2524_s29 = smov [#allocation10]  }
  0x19   : > { %s3108_s25 = scalar_select %p2661_p1, 1, 0 }
  0x1a   : > { %p2666_p3 = pnand %p1778_p0, %p422_p2  ;;  %s437_s28 = sshll.u32 %s2523_s27, 4  ;;  %s438_s28 = int_to_ptr.vmem [resolvable:$true] %s437_s28 }
  0x1b   : > { %s463_s30 = sshll.u32 %s2524_s29, 4  ;;  %s2525_s17 = smov [#allocation13]   ;;  %s464_s30 = int_to_ptr.vmem [resolvable:$true] %s463_s30 }
  0x1c   : > { %s3109_s26 = scalar_select %p2666_p3, 1, 0 }
  0x1d   : > { %p2004_p5 = pneg %p2666_p3  ;;  %s485_s24 = sshll.u32 %s2525_s17, 4  ;;  %s2679_s24 = int_to_ptr.vmem [resolvable:$true] %s485_s24 }
  0x1e   : > { %s2200_s15 = scalar_lea.vmem %s438_s28, 128  ;;  %p2208_p11 = scmp.lt.s32.totalorder %s438_s28, %s438_s28 }
  0x1f   : > { %p2675_p6 = pnand %p2004_p5, %p2661_p1  ;;  %p2201_p8 = scmp.ne.s32.totalorder %s438_s28, %s2200_s15 }
  0x20   : > { %p2209_p12 = scmp.lt.s32.totalorder %s2200_s15, %s2200_s15 }
  0x21   : > { %p2683_p7 = pneg %p2675_p6 }
  0x22   : > { %p2210_p13 = por %p2209_p12, %p2208_p11 }
  0x23   : > { %p2203_p9 = pnand %p2201_p8, %p2683_p7 }
  0x25   : > { %p2204_p10 = pneg %p2203_p9 }
  0x27   : > { %p2211_p0 = pnand %p2210_p13, %p2204_p10 }
  0x29   : > { %2214 = shalt.err (!%p2211_p0)
}
  0x2a   : > { %s3112_s2 = sld [smem:[#allocation27_spill]]  ;;  %s2226_s14 = scalar_lea.vmem %s464_s30, 128 }
  0x2b   : > { %p2227_p2 = scmp.ne.s32.totalorder %s464_s30, %s2226_s14  ;;  %p2234_p3 = scmp.lt.s32.totalorder %s464_s30, %s464_s30 }
  0x2c   : > { %p2235_p8 = scmp.lt.s32.totalorder %s2226_s14, %s2226_s14 }
  0x2d   : > { %p2229_p5 = pnand %p2227_p2, %p2683_p7 }
  0x2e   : > { %p2236_p9 = por %p2235_p8, %p2234_p3 }
  0x2f   : > { %p2230_p4 = pneg %p2229_p5 }
  0x30   : > { %2007 = dma.hbm_to_vmem [thread:$0]  (!%p2675_p6), %s3112_s2, 128, %s438_s28, [#allocation8]  }
  0x31   : > { %p2237_p1 = pnand %p2236_p9, %p2230_p4 }
  0x33   : > { %2240 = shalt.err (!%p2237_p1)
}
  0x34   : > { %s3113_s4 = sld [smem:[#allocation29_spill]]  ;;  %s2252_s28 = scalar_lea.vmem %s2679_s24, 128 }
  0x35   : > { %p2253_p10 = scmp.ne.s32.totalorder %s2679_s24, %s2252_s28  ;;  %p2260_p13 = scmp.lt.s32.totalorder %s2679_s24, %s2679_s24 }
  0x36   : > { %p2261_p3 = scmp.lt.s32.totalorder %s2252_s28, %s2252_s28 }
  0x37   : > { %p2255_p11 = pnand %p2253_p10, %p2683_p7 }
  0x38   : > { %p2262_p4 = por %p2261_p3, %p2260_p13 }
  0x39   : > { %p2256_p12 = pneg %p2255_p11 }
  0x3a   : > { %2013 = dma.hbm_to_vmem [thread:$0]  (!%p2675_p6), %s3113_s4, 128, %s464_s30, [#allocation11]  }
  0x3b   : > { %p2263_p1 = pnand %p2262_p4, %p2256_p12 }
  0x3d   : > { %2266 = shalt.err (!%p2263_p1)
}
  0x3e   : > { %s3114_s6 = sld [smem:[#allocation31_spill]]  ;;  %s2526_s30 = smov [#allocation16]  }
  0x3f   : > { %s515_s29 = sshll.u32 %s2526_s30, 4  ;;  %s516_s29 = int_to_ptr.vmem [resolvable:$true] %s515_s29 }
  0x40   : > { %s2278_s17 = scalar_lea.vmem %s516_s29, 512  ;;  %p2286_p8 = scmp.lt.s32.totalorder %s516_s29, %s516_s29 }
  0x41   : > { %p2279_p0 = scmp.ne.s32.totalorder %s516_s29, %s2278_s17  ;;  %p2287_p9 = scmp.lt.s32.totalorder %s2278_s17, %s2278_s17 }
  0x43   : > { %p2281_p2 = pnand %p2279_p0, %p2683_p7  ;;  %p2288_p10 = por %p2287_p9, %p2286_p8 }
  0x44   : > { %2019 = dma.hbm_to_vmem [thread:$0]  (!%p2675_p6), %s3114_s6, 128, %s2679_s24, [#allocation14]  }
  0x45   : > { %p2282_p5 = pneg %p2281_p2 }
  0x47   : > { %p2289_p11 = pnand %p2288_p10, %p2282_p5 }
  0x49   : > { %2292 = shalt.err (!%p2289_p11)
}
  0x4a   : > { %s3095_s15 = smov 64   ;;  %s2528_s28 = smov 4  }
  0x4b   : > { %s3115_s11 = sld [smem:[#allocation34_spill]]  ;;  %s2529_s14 = smov [#allocation9]  }
  0x4c   : > { %s450_s30 = sshll.u32 %s2529_s14, 4  ;;  %s2530_s2 = smov [#allocation12]   ;;  %s451_s30 = int_to_ptr.vmem [resolvable:$true] %s450_s30 }
  0x4d   : > { %s474_s4 = sshll.u32 %s2530_s2, 4  ;;  %s2304_s17 = scalar_lea.vmem %s451_s30, 128  ;;  %s475_s4 = int_to_ptr.vmem [resolvable:$true] %s474_s4 }
  0x4e   : > { %p2305_p12 = scmp.ne.s32.totalorder %s451_s30, %s2304_s17  ;;  %p2312_p4 = scmp.lt.s32.totalorder %s451_s30, %s451_s30 }
  0x4f   : > { %p2313_p1 = scmp.lt.s32.totalorder %s2304_s17, %s2304_s17 }
  0x50   : > { %p2307_p13 = pnand %p2305_p12, %p2683_p7 }
  0x51   : > { %2025 = dma.hbm_to_vmem [thread:$0]  (!%p2675_p6), %s3115_s11, 512, %s516_s29, [#allocation17], %s3095_s15, %s3095_s15, %s2528_s28  }
  0x52   : > { %p2308_p3 = pneg %p2307_p13  ;;  %p2314_p0 = por %p2313_p1, %p2312_p4 }
  0x54   : > { %p2315_p2 = pnand %p2314_p0, %p2308_p3 }
  0x56   : > { %2318 = shalt.err (!%p2315_p2)
}
  0x57   : > { %s3116_s3 = sld [smem:[#allocation28_spill]]  ;;  %s2330_s2 = scalar_lea.vmem %s475_s4, 128 }
  0x58   : > { %p2331_p5 = scmp.ne.s32.totalorder %s475_s4, %s2330_s2  ;;  %p2338_p10 = scmp.lt.s32.totalorder %s475_s4, %s475_s4 }
  0x59   : > { %p2339_p11 = scmp.lt.s32.totalorder %s2330_s2, %s2330_s2 }
  0x5a   : > { %p2333_p8 = pnand %p2331_p5, %p2683_p7 }
  0x5b   : > { %p2340_p12 = por %p2339_p11, %p2338_p10 }
  0x5c   : > { %p2334_p9 = pneg %p2333_p8 }
  0x5d   : > { %2010 = dma.hbm_to_vmem [thread:$0]  (!%p2675_p6), %s3116_s3, 128, %s451_s30, [#allocation8]  }
  0x5e   : > { %p2341_p13 = pnand %p2340_p12, %p2334_p9 }
  0x60   : > { %2344 = shalt.err (!%p2341_p13)
}
  0x61   : > { %s3117_s5 = sld [smem:[#allocation30_spill]]  ;;  %s2531_s17 = smov [#allocation15]  }
  0x62   : > { %s496_s24 = sshll.u32 %s2531_s17, 4  ;;  %s2532_s30 = smov [#allocation18]   ;;  %s497_s24 = int_to_ptr.vmem [resolvable:$true] %s496_s24 }
  0x63   : > { %s528_s29 = sshll.u32 %s2532_s30, 4  ;;  %s2356_s15 = scalar_lea.vmem %s497_s24, 128  ;;  %s529_s29 = int_to_ptr.vmem [resolvable:$true] %s528_s29 }
  0x64   : > { %p2357_p3 = scmp.ne.s32.totalorder %s497_s24, %s2356_s15  ;;  %p2364_p0 = scmp.lt.s32.totalorder %s497_s24, %s497_s24 }
  0x65   : > { %p2365_p2 = scmp.lt.s32.totalorder %s2356_s15, %s2356_s15 }
  0x66   : > { %p2359_p4 = pnand %p2357_p3, %p2683_p7 }
  0x67   : > { %2016 = dma.hbm_to_vmem [thread:$0]  (!%p2675_p6), %s3117_s5, 128, %s475_s4, [#allocation11]  }
  0x68   : > { %p2360_p1 = pneg %p2359_p4  ;;  %p2366_p5 = por %p2365_p2, %p2364_p0 }
  0x6a   : > { %p2367_p8 = pnand %p2366_p5, %p2360_p1 }
  0x6c   : > { %2370 = shalt.err (!%p2367_p8)
}
  0x6d   : > { %s3118_s7 = sld [smem:[#allocation32_spill]]  ;;  %s2382_s9 = scalar_lea.vmem %s529_s29, 512 }
  0x6e   : > { %p2383_p9 = scmp.ne.s32.totalorder %s529_s29, %s2382_s9  ;;  %p2390_p12 = scmp.lt.s32.totalorder %s529_s29, %s529_s29 }
  0x6f   : > { %p2391_p13 = scmp.lt.s32.totalorder %s2382_s9, %s2382_s9 }
  0x70   : > { %p2385_p10 = pnand %p2383_p9, %p2683_p7 }
  0x71   : > { %p2392_p3 = por %p2391_p13, %p2390_p12 }
  0x72   : > { %p2386_p11 = pneg %p2385_p10 }
  0x73   : > { %2022 = dma.hbm_to_vmem [thread:$0]  (!%p2675_p6), %s3118_s7, 128, %s497_s24, [#allocation14]  }
  0x74   : > { %p2393_p4 = pnand %p2392_p3, %p2386_p11 }
  0x76   : > { %2396 = shalt.err (!%p2393_p4)
}
  0x77   : > { %s3119_s15 = smov 64   ;;  %s3120_s12 = sld [smem:[#allocation35_spill]] }
  0x78   : > { %s1777_s16 = sadd.s32 4294967294, %s2521_s23   ;;  %s47_s27 = sadd.s32 1, %s2517_s22 }
  0x79   : > { %p49_p7 = scmp.ge.s32.totalorder %s47_s27, 2  ;;  %s82_s24 = sadd.s32 1, %s2509_s20 }
  0x7a   : > { %p89_p1 = scmp.ne.s32.totalorder %s2509_s20, %s2505_s19  ;;  %p90_p0 = scmp.eq.s32.totalorder %s2521_s23, 0 }
  0x7b   : > { %s3146_s27 = smov (%p49_p7, %s47_s27), 0  ;;  %p95_p5 = scmp.ne.s32.totalorder %s2505_s19, %s2501_s18 }
  0x7c   : > { %3121 = sst [smem:[#allocation26_spill]] %s3146_s27  ;;  %p2762_p2 = por %p90_p0, %p89_p1 }
  0x7d   : > { %2028 = dma.hbm_to_vmem [thread:$0]  (!%p2675_p6), %s3120_s12, 512, %s529_s29, [#allocation17], %s3119_s15, %s3119_s15, %s2528_s28  }
  0x7e   : > { %s79_s28 = ssub.s32 %s2517_s22, %s3146_s27  ;;  %s3123_s29 = sadd.s32 4294967295, %s2521_s23  }
  0x7f   : > { %p409_p6 = scmp.eq.s32.totalorder %s3123_s29, 1  ;;  %p80_p8 = scmp.eq.s32.totalorder %s79_s28, 0 }
  0x80   : > { %p3124_p9 = scmp.ne.s32.totalorder %s3108_s25, 0  ;;  %p415_p12 = scmp.eq.s32.totalorder %s1777_s16, 1 }
  0x81   : > { %p2778_p11 = por %p409_p6, %p89_p1  ;;  %p2045_p3 = scmp.lt.s32.totalorder %s2521_s23, 2 }
  0x82   : > { %p2774_p10 = por %p3124_p9, %p95_p5  ;;  %p2785_p13 = por %p415_p12, %p95_p5 }
  0x83   : > { %s2783_s9 = scalar_select %p80_p8, %s2509_s20, %s82_s24  }
  0x84   : > { %s558_s14 = sand.u32 1, %s2509_s20   ;;  %s1789_s17 = sshll.u32 %s2517_s22, 7 }
  0x85   : > { %s1788_s28 = sshll.u32 %s558_s14, 3  ;;  %s567_s5 = scalar_lea.hbm %s3074_s1, %s1789_s17 }
  0x86   : > { %s562_s6 = scalar_lea.vmem [#allocation4], %s1788_s28  ;;  %p2797_p4 = pnand %p2045_p3, %p2762_p2 }
  0x87   : > { %s569_s7 = sshll.u32 %s562_s6, 4  ;;  %s559_s16 = scalar_lea.sflag [#allocation5], %s558_s14  ;;  %s570_s7 = int_to_ptr.vmem [resolvable:$true] %s569_s7 }
  0x88   : > { %p2399_p7 = pneg %p2797_p4  ;;  %s2410_s24 = scalar_lea.vmem %s570_s7, 128 }
  0x89   : > { %p2411_p1 = scmp.ne.s32.totalorder %s570_s7, %s2410_s24  ;;  %s2533_s12 = smov [#allocation4]  }
  0x8a   : > { %s2415_s27 = sshll.u32 %s2533_s12, 4  ;;  %s2416_s27 = int_to_ptr.vmem [resolvable:$false] %s2415_s27 }
  0x8b   : > { %p2413_p0 = pnand %p2411_p1, %p2399_p7  ;;  %s2417_s3 = scalar_lea.vmem %s2416_s27, 256 }
  0x8c   : > { %p2418_p6 = scmp.lt.s32.totalorder %s570_s7, %s2416_s27  ;;  %p2419_p8 = scmp.lt.s32.totalorder %s2417_s3, %s2410_s24 }
  0x8d   : > { %p2414_p5 = pneg %p2413_p0 }
  0x8e   : > { %p2420_p9 = por %p2419_p8, %p2418_p6 }
  0x90   : > { %p2421_p2 = pnand %p2420_p9, %p2414_p5 }
  0x92   : > { %2424 = shalt.err (!%p2421_p2)
}
  0x93   : > { %2032 = dma.hbm_to_vmem [thread:$0]  (!%p2797_p4), %s567_s5, 128, %s570_s7, %s559_s16  }
  0x94   : > { %p3129_p12 = scmp.ne.s32.totalorder %s3109_s26, 0 }
  0x95   : > { %s2808_s6 = sand.u32 (!%p3129_p12), 1, %s2505_s19  }
  0x96   : > { %578 = sbr.rel (%p3129_p12) target bundleno = 2930 (0xb72), region = 80  ;;  %s1791_s12 = sshll.u32 (!%p3129_p12), %s2808_s6, 3 }
  0x97   : > { %s581_s30 = scalar_lea.sflag (!%p3129_p12), [#allocation5], %s2808_s6  ;;  %s584_s27 = scalar_lea.vmem (!%p3129_p12), [#allocation4], %s1791_s12 }
  0x9b   : > { %2476 = dma.done.wait (%p2774_p10), %s581_s30, 128  }
  0x9c   : > { %2478 = vsyncadd (%p2774_p10), %s581_s30, 4294967168  ;;  %p3130_p3 = scmp.ne.s32.totalorder %s3108_s25, 0 }
  0x9e   : > { %2480 = dma.done.wait (%p3130_p3), [#allocation8], 256  }
  0x9f   : > { %2482 = vsyncadd (%p3130_p3), [#allocation8], 4294967040 }
  0xa0   : > { %2484 = dma.done.wait (%p3130_p3), [#allocation11], 256  }
  0xa1   : > { %2486 = vsyncadd (%p3130_p3), [#allocation11], 4294967040 }
  0xa2   : > { %2488 = dma.done.wait (%p3130_p3), [#allocation14], 256  }
  0xa3   : > { %2490 = vsyncadd (%p3130_p3), [#allocation14], 4294967040 }
  0xa4   : > { %2492 = dma.done.wait (%p3130_p3), [#allocation17], 1024  }
  0xa5   : > { %2494 = vsyncadd (%p3130_p3), [#allocation17], 4294966272  ;;  %p670_p10 = scmp.lt.s32.totalorder %s2513_s21, 1  ;;  %vm685_vm0 = vcmask 523264   ;;  %v682_v1 = vld [vmem:[%s584_s27] sm:$0xff]  ;;  %v2130_v6 = vld [vmem:[%s3083_s10 + $0x18] sm:$0xff]  }
  0xa6   : > { %v684_v3 = vmul.f32 %v682_v1, %v682_v1  ;;  %v2534_v7 = vmov 0.0   ;;  %v2131_v8 = vld [vmem:[%s3083_s10 + $0x10] sm:$0xff]   ;;  %v2133_v9 = vld [vmem:[#allocation16 + $0x18] sm:$0xff]   ;;  %vm2535_vm1 = vmmov 0   ;;  %v2132_v10 = vld [vmem:[%s3083_s10 + $0x8] sm:$0xff]   ;;  %s2538_s11 = smov 56  }
  0xa7   : > { %s671_s5 = scalar_select %p670_p10, %s2513_s21, 1  ;;  %1896 = vmatprep.subr.bf16.mxu1 %v2534_v7  ;;  %1884 = vmatprep.subr.bf16.mxu0 %v2534_v7  ;;  %v2134_v11 = vld [vmem:[%s3083_s10] sm:$0xff]   ;;  %v2135_v12 = vld [vmem:[#allocation16 + $0x10] sm:$0xff]   ;;  %v2136_v13 = vld [vmem:[#allocation16 + $0x8] sm:$0xff]   ;;  %vm915_vm2 = vcmask 457728   ;;  %vm792_vm3 = vcmask 64512  }
  0xa8   : > { %v686_v5 = vsel %vm685_vm0, %v684_v3, 0.0  ;;  %1897 = vmatpush3.bf16.msra.mxu1 %v2130_v6  ;;  %1904 = vmatprep.mubr.msk.bf16.mxu1 %vm2535_vm1, %v2534_v7  ;;  %v2137_v14 = vld [vmem:[#allocation16] sm:$0xff]   ;;  %v1809_v22 = vld [vmem:[%s3081_s8] ss:$0 sm:$0xff]  ;;  %s2539_s26 = smov 8   ;;  %s2541_s25 = smov 104  }
  0xa9   : > { %s1801_s7 = sshll.u32 %s671_s5, 3  ;;  %1898 = vmatprep.subr.bf16.mxu1 %v2534_v7  ;;  %1892 = vmatprep.mubr.msk.bf16.mxu0 %vm2535_vm1, %v2534_v7  ;;  %s2536_s5 = smov 120   ;;  %v927_v39 = vld [vmem:[#allocation9] sm:$0xff]  ;;  %v925_v41 = vld [vmem:[#allocation7] sm:$0xff]  ;;  %v930_v44 = vld [vmem:[#allocation10] sm:$0xff]  ;;  %vm784_vm4 = vcmask 195584  }
  0xaa   : > { %s676_s2 = scalar_lea.vmem %s3073_s0, %s1801_s7  ;;  %1885 = vmatpush3.bf16.msra.mxu0 %v2133_v9  ;;  %s2537_s7 = smov 72   ;;  %v796_v55 = vld [vmem:[#allocation13] sm:$0xff]  ;;  %v794_v58 = vld [vmem:[#allocation12] sm:$0xff]  ;;  %v799_v60 = vld [vmem:[#allocation15] sm:$0xff]  ;;  %vm803_vm5 = vcmask 257024   ;;  %vm984_vm6 = vcmask 130048  }
  0xab   : > { %v2839_v0 = vld [vmem:[%s676_s2] sm:$0xff]  ;;  %1886 = vmatprep.subr.bf16.mxu0 %v2534_v7  ;;  %s2540_s2 = smov 24   ;;  %s2542_s14 = smov 112   ;;  %vm1060_vm9 = vcmask 1043456   ;;  %vm1261_vm10 = vcmask 261120  }
  0xac   : > { %v815_v2 = vmul.f32 %v2839_v0, %v2839_v0  ;;  %1899 = vmatpush3.bf16.msra.mxu1 %v2131_v8  ;;  %s2543_s17 = smov 96   ;;  %s2544_s28 = smov 16  }
  0xad   : > { %1900 = vmatprep.subr.bf16.mxu1 %v2534_v7  ;;  %s3135_s3 = sld [smem:[#allocation33_spill]] }
  0xae   : > { %v817_v4 = vsel %vm685_vm0, %v815_v2, 0.0  ;;  %1887 = vmatpush3.bf16.msra.mxu0 %v2135_v12 }
  0xaf   : > { %818 = vadd.xlane.f32.xlu0 %v817_v4  ;;  %1888 = vmatprep.subr.bf16.mxu0 %v2534_v7 }
  0xb0   : > { %1901 = vmatpush3.bf16.msra.mxu1 %v2132_v10  ;;  %v944_v10 = vlaneseq }
  0xb1   : > { %1902 = vmatprep.subr.bf16.mxu1 %v2534_v7 }
  0xb2   : > { %1889 = vmatpush3.bf16.msra.mxu0 %v2136_v13  ;;  %v948_v12 = vand.u32 127, %v944_v10 }
  0xb3   : > { %687 = vadd.xlane.f32.xlu0 %v686_v5  ;;  %1890 = vmatprep.subr.bf16.mxu0 %v2534_v7 }
  0xb4   : > { %1903 = vmatpush3.bf16.msra.mxu1 %v2134_v11  ;;  %v945_v11 = vshrl.u32 %v944_v10, 7 }
  0xb5   : > { %1926 = vmatprep.subr.bf16.mxu1 %v2534_v7 }
  0xb6   : > { %1891 = vmatpush3.bf16.msra.mxu0 %v2137_v14  ;;  %v954_v13 = vand.u32 7, %v945_v11  ;;  %v946_v14 = vadd.s32 8, %v945_v11 }
  0xb7   : > { %1908 = vmatprep.subr.bf16.mxu0 %v2534_v7 }
  0xb8   : > { %vm2897_vm7 = vcmp.le.s32.totalorder %v948_v12, %v954_v13 }
 0x138   : > { %v819_v15 = vpop.xlane.xlu0 %818 }
 0x139   : > { %v821_v16 = vmul.f32 0.015625, %v819_v15 }
 0x13b   : > { %v822_v17 = vadd.f32 1e-05, %v821_v16  ;;  %v961_v16 = vand.u32 7, %v946_v14 }
 0x13c   : > { %v688_v18 = vpop.xlane.xlu0 %687 }
 0x13d   : > { %2163 = vrsqrt.f32 %v822_v17  ;;  %v690_v19 = vmul.f32 0.015625, %v688_v18  ;;  %vm2904_vm8 = vcmp.le.s32.totalorder %v948_v12, %v961_v16 }
 0x13f   : > { %v691_v20 = vadd.f32 1e-05, %v690_v19 }
 0x141   : > { %2165 = vrsqrt.f32 %v691_v20 }
 0x14a   : > { %v2164_v21 = vpop.eup %2163 }
 0x14b   : > { %v824_v23 = vmul.f32 %v2164_v21, %v2839_v0  ;;  %v2139_v21 = vld [vmem:[#allocation18 + $0x18] sm:$0xff]  }
 0x14d   : > { %v831_v24 = vmul.f32 %v1809_v22, %v824_v23 }
 0x14e   : > { %v2166_v25 = vpop.eup %2165 }
 0x14f   : > { %v832_v26 = vpack.c.bf16 %v831_v24, %v831_v24  ;;  %v693_v27 = vmul.f32 %v2166_v25, %v682_v1 }
 0x151   : > { %1905 = vmatmul.mubr.msk.bf16.vlgmr.msra.gmra.mxu1 %vm685_vm0, %v832_v26  ;;  %v700_v28 = vmul.f32 %v1809_v22, %v693_v27 }
 0x152   : > { %1928 = vmatprep.mubr.msk.bf16.mxu1 %vm2535_vm1, %v2534_v7 }
 0x153   : > { %v701_v29 = vpack.c.bf16 %v700_v28, %v700_v28 }
 0x155   : > { %1893 = vmatmul.mubr.msk.bf16.vlgmr.msra.gmra.mxu0 %vm685_vm0, %v701_v29 }
 0x156   : > { %1910 = vmatprep.mubr.msk.bf16.mxu0 %vm2535_vm1, %v2534_v7 }
 0x211   : > { %v902_v30 = vpop.f32.mrf.mxu1 }
 0x212   : > { %909 = vrot.lane.b32.xlu1 %v902_v30, %s2536_s5  ;;  %917 = vrot.lane.b32.xlu0 %v902_v30, %s2537_s7  ;;  %v926_v46 = vmul.f32 %v925_v41, %v902_v30  ;;  %s1847_s7 = sshll.u32 %s2513_s21, 7  ;;  %s1586_s21 = scalar_lea.sflag [#allocation6], %s2808_s6 }
 0x213   : > { %v1906_v31 = vpop.f32.mrf.mxu1 }
 0x215   : > { %v905_v32 = vpop.f32.mrf.mxu1  ;;  %v2881_v33 = vpop.f32.mrf.mxu0 }
 0x216   : > { %912 = vrot.lane.b32.xlu1 %v902_v30, %s2538_s11  ;;  %v795_v61 = vmul.f32 %v794_v58, %v2881_v33  ;;  %v1850_v26 = vpack.c.bf16 %v2881_v33, %v2881_v33  ;;  %s669_s11 = scalar_lea.vmem [#allocation19], %s1791_s12 }
 0x217   : > { %v1907_v34 = vpop.f32.mrf.mxu1  ;;  %v1894_v35 = vpop.f32.mrf.mxu0 }
 0x219   : > { %v774_v36 = vpop.f32.mrf.mxu0 }
 0x21a   : > { %920 = vrot.lane.b32.xlu1 %v902_v30, %s2539_s26 }
 0x21b   : > { %v1895_v37 = vpop.f32.mrf.mxu0 }
 0x21e   : > { %778 = vrot.lane.b32.xlu1 %v2881_v33, %s2536_s5  ;;  %s3136_s5 = sld [smem:[#allocation36_spill]] }
 0x222   : > { %781 = vrot.lane.b32.xlu1 %v2881_v33, %s2540_s2 }
 0x226   : > { %786 = vrot.lane.b32.xlu1 %v2881_v33, %s2541_s25 }
 0x22a   : > { %789 = vrot.lane.b32.xlu1 %v2881_v33, %s2539_s26  ;;  %s1600_s26 = sshll.u32 %s669_s11, 4  ;;  %s3026_s26 = int_to_ptr.vmem [resolvable:$true] %s1600_s26 }
 0x22b   : > { %s2425_s12 = scalar_lea.vmem %s3026_s26, 128 }
 0x22c   : > { %p2426_p4 = scmp.ne.s32.totalorder %s3026_s26, %s2425_s12 }
 0x22e   : > { %p2427_p7 = pnand %p2426_p4, %p2778_p11 }
 0x230   : > { %p2428_p1 = pneg %p2427_p7 }
 0x284   : > { %v910_v38 = vpop.permute.xlu1 %909  ;;  %v918_v45 = vpop.permute.xlu0 %917 }
 0x288   : > { %v913_v40 = vpop.permute.xlu1 %912 }
 0x289   : > { %v916_v42 = vsel %vm915_vm2, %v910_v38, %v913_v40 }
 0x28a   : > { %v928_v43 = vmul.f32 %v927_v39, %v916_v42 }
 0x28c   : > { %v921_v47 = vpop.permute.xlu1 %920  ;;  %v929_v49 = vadd.f32 %v928_v43, %v926_v46 }
 0x28d   : > { %v924_v48 = vsel %vm792_vm3, %v918_v45, %v921_v47 }
 0x28e   : > { %v931_v50 = vmul.f32 %v930_v44, %v924_v48 }
 0x290   : > { %v779_v51 = vpop.permute.xlu1 %778  ;;  %v932_v52 = vadd.f32 %v931_v50, %v929_v49 }
 0x292   : > { %v933_v53 = vmul.f32 0.25, %v932_v52 }
 0x294   : > { %v782_v54 = vpop.permute.xlu1 %781  ;;  %980 = vrot.lane.b32.xlu1 %v933_v53, %s2542_s14 }
 0x295   : > { %v785_v56 = vsel %vm784_vm4, %v779_v51, %v782_v54 }
 0x296   : > { %v797_v59 = vmul.f32 %v796_v55, %v785_v56 }
 0x298   : > { %v787_v57 = vpop.permute.xlu1 %786  ;;  %v798_v1 = vadd.f32 %v797_v59, %v795_v61 }
 0x29c   : > { %v790_v62 = vpop.permute.xlu1 %789 }
 0x29d   : > { %v793_v63 = vsel %vm792_vm3, %v787_v57, %v790_v62 }
 0x29e   : > { %v800_v2 = vmul.f32 %v799_v60, %v793_v63 }
 0x2a0   : > { %v801_v3 = vadd.f32 %v800_v2, %v798_v1 }
 0x2a2   : > { %v802_v4 = vpack.c.bf16 %v801_v3, %v801_v3 }
 0x2a4   : > { %804 = vst.msk [vmem:[#allocation2] sm:$0xf] %vm803_vm5, %v802_v4 }
 0x2ab   : > { %v934_v5 = vld [vmem:[#allocation2] sm:$0xf] }
 0x2ac   : > { %v989_v6 = vsel %vm984_vm6, %v934_v5, 0  ;;  %v1817_v40 = vcombine.low %v934_v5, %v934_v5 }
 0x2ad   : > { %1909 = vmatpush3.bf16.xpose.msra.mxu0 %v989_v6 }
 0x2ae   : > { %1914 = vmatprep.subr.bf16.mxu0 %v2534_v7 }
 0x306   : > { %v981_v8 = vpop.permute.xlu1 %980 }
 0x307   : > { %v983_v9 = vpack.c.bf16 %v981_v8, %v933_v53 }
 0x309   : > { %1911 = vmatmul.mubr.msk.bf16.vlgmr.msra.gmra.mxu0 %vm984_vm6, %v983_v9 }
 0x30a   : > { %1916 = vmatprep.mubr.msk.bf16.mxu0 %vm2535_vm1, %v2534_v7 }
 0x3c9   : > { %v1025_v17 = vpop.f32.mrf.mxu0 }
 0x3ca   : > { %v1032_v18 = vsel %vm2897_vm7, %v1025_v17, -1e+09 }
 0x3cb   : > { %v1912_v19 = vpop.f32.mrf.mxu0  ;;  %v1034_v20 = vsel %vm792_vm3, %v1032_v18, -inf }
 0x3cc   : > { %1035 = vmax.xlane.f32.xlu0 %v1034_v20 }
 0x3cd   : > { %v1028_v22 = vpop.f32.mrf.mxu0 }
 0x3ce   : > { %v1033_v23 = vsel %vm2904_vm8, %v1028_v22, -1e+09  ;;  %v2140_v22 = vld [vmem:[#allocation18 + $0x8] sm:$0xff]  }
 0x3cf   : > { %v1913_v24 = vpop.f32.mrf.mxu0  ;;  %v1037_v25 = vsel %vm792_vm3, %v1033_v23, -inf }
 0x3d0   : > { %1038 = vmax.xlane.f32.xlu1 %v1037_v25  ;;  %v2142_v24 = vld [vmem:[#allocation18] sm:$0xff]  }
 0x3e1   : > { %809 = vrot.lane.b32.xlu1 %v1850_v26, %s2543_s17 }
 0x3e5   : > { %1112 = vrot.lane.b32.xlu1 %v983_v9, %s2543_s17 }
 0x455   : > { %v1036_v27 = vpop.xlane.xlu0 %1035 }
 0x456   : > { %v1040_v28 = vsub.f32 %v1032_v18, %v1036_v27 }
 0x458   : > { %v1042_v29 = vmul.f32 1.442695, %v1040_v28 }
 0x459   : > { %v1039_v30 = vpop.xlane.xlu1 %1038 }
 0x45a   : > { %2167 = vpow2.f32 %v1042_v29  ;;  %v1041_v31 = vsub.f32 %v1033_v23, %v1039_v30  ;;  %v2141_v23 = vld [vmem:[#allocation18 + $0x10] sm:$0xff]  }
 0x45c   : > { %v1044_v32 = vmul.f32 1.442695, %v1041_v31 }
 0x45d   : > { %v810_v34 = vpop.permute.xlu1 %809 }
 0x45e   : > { %2169 = vpow2.f32 %v1044_v32  ;;  %812 = vst.msk [vmem:[#allocation3] sm:$0xf] %vm803_vm5, %v810_v34 }
 0x461   : > { %v1113_v50 = vpop.permute.xlu1 %1112 }
 0x465   : > { %v935_v35 = vld [vmem:[#allocation3] sm:$0xf] }
 0x466   : > { %v1062_v36 = vsel %vm1060_vm9, %v935_v35, 0  ;;  %v1819_v11 = vcombine.low %v935_v35, %v935_v35 }
 0x467   : > { %v2168_v37 = vpop.eup %2167  ;;  %1915 = vmatpush3.bf16.msra.mxu0 %v1062_v36 }
 0x468   : > { %v1046_v33 = vsel %vm792_vm3, %v2168_v37, 0.0  ;;  %1920 = vmatprep.subr.bf16.mxu0 %v2534_v7 }
 0x469   : > { %1047 = vadd.xlane.f32.xlu0 %v1046_v33 }
 0x46b   : > { %v2170_v38 = vpop.eup %2169 }
 0x46c   : > { %v1049_v39 = vsel %vm792_vm3, %v2170_v38, 0.0 }
 0x46d   : > { %1050 = vadd.xlane.f32.xlu0 %v1049_v39 }
 0x483   : > { %1117 = vrot.lane.b32.xlu0 %v1817_v40, %s2542_s14 }
 0x4f2   : > { %v1048_v41 = vpop.xlane.xlu0 %1047 }
 0x4f3   : > { %2171 = vrcp.f32 %v1048_v41 }
 0x4f6   : > { %v1051_v42 = vpop.xlane.xlu0 %1050 }
 0x4f7   : > { %2173 = vrcp.f32 %v1051_v42 }
 0x4fa   : > { %v1118_v47 = vpop.permute.xlu0 %1117 }
 0x4fb   : > { %v1123_v49 = vsel %vm984_vm6, %v1118_v47, 0 }
 0x500   : > { %v2172_v43 = vpop.eup %2171 }
 0x501   : > { %v1054_v45 = vmul.f32 %v2172_v43, %v2168_v37 }
 0x504   : > { %v2174_v44 = vpop.eup %2173 }
 0x505   : > { %v1055_v46 = vmul.f32 %v2174_v44, %v2170_v38 }
 0x507   : > { %v1056_v48 = vpack.c.bf16 %v1055_v46, %v1054_v45 }
 0x509   : > { %1917 = vmatmul.mubr.msk.bf16.vlgmr.msra.gmra.mxu0 %vm792_vm3, %v1056_v48 }
 0x50a   : > { %1921 = vmatpush3.bf16.xpose.msra.mxu0 %v1123_v49  ;;  %1922 = vmatprep.mubr.msk.bf16.mxu0 %vm2535_vm1, %v2534_v7  ;;  %v2143_v49 = vld [vmem:[%s3086_s13 + $0x30] ss:$8 sps:$4 sm:$0xff]  }
 0x50b   : > { %1932 = vmatprep.subr.bf16.mxu0 %v2534_v7 }
 0x511   : > { %1923 = vmatmul.mubr.msk.bf16.vlgmr.msra.gmra.mxu0 %vm984_vm6, %v1113_v50  ;;  %v2145_v50 = vld [vmem:[%s3086_s13 + $0x34] ss:$8 sps:$4 sm:$0xff]  }
 0x512   : > { %1936 = vmatprep.mubr.msk.bf16.mxu0 %vm2535_vm1, %v2534_v7  ;;  %1933 = vmatpush3.bf16.msra.mxu0 %v2139_v21 }
 0x513   : > { %1934 = vmatprep.subr.bf16.mxu0 %v2534_v7 }
 0x516   : > { %1935 = vmatpush3.bf16.msra.mxu0 %v2141_v23 }
 0x517   : > { %1437 = vmatprep.subr.bf16.mxu0 %v2145_v50 }
 0x5c9   : > { %v2927_v51 = vpop.f32.mrf.mxu0 }
 0x5cb   : > { %v1918_v52 = vpop.f32.mrf.mxu0 }
 0x5cc   : > { %v2545_v52 = vmov 0  }
 0x5cd   : > { %v1101_v53 = vpop.f32.mrf.mxu0 }
 0x5cf   : > { %v1919_v54 = vpop.f32.mrf.mxu0 }
 0x5d0   : > { %v2149_v54 = vld [vmem:[%s3086_s13 + $0x10] ss:$8 sps:$4 sm:$0xff]  }
 0x5d1   : > { %v1159_v55 = vpop.f32.mrf.mxu0 }
 0x5d2   : > { %v1166_v56 = vsel %vm2897_vm7, %v1159_v55, -1e+09  ;;  %v2154_v55 = vld [vmem:[%s3086_s13 + $0x4] ss:$8 sps:$4 sm:$0xff]  }
 0x5d3   : > { %v1924_v57 = vpop.f32.mrf.mxu0  ;;  %v1168_v58 = vsel %vm792_vm3, %v1166_v56, -inf }
 0x5d4   : > { %1169 = vmax.xlane.f32.xlu1 %v1168_v58 }
 0x5d5   : > { %v1162_v59 = vpop.f32.mrf.mxu0 }
 0x5d6   : > { %v1167_v60 = vsel %vm2904_vm8, %v1162_v59, -1e+09 }
 0x5d7   : > { %v1925_v61 = vpop.f32.mrf.mxu0  ;;  %v1171_v62 = vsel %vm792_vm3, %v1167_v60, -inf }
 0x5d8   : > { %1172 = vmax.xlane.f32.xlu0 %v1171_v62  ;;  %v1827_v61 = vld [vmem:[%s3135_s3] ss:$0 sm:$0xff] }
 0x65d   : > { %v1170_v63 = vpop.xlane.xlu1 %1169 }
 0x65e   : > { %v1174_v1 = vsub.f32 %v1166_v56, %v1170_v63  ;;  %v2152_v56 = vld [vmem:[%s3086_s13] ss:$8 sps:$4 sm:$0xff]  }
 0x660   : > { %v1176_v2 = vmul.f32 1.442695, %v1174_v1 }
 0x661   : > { %v1173_v3 = vpop.xlane.xlu0 %1172 }
 0x662   : > { %2175 = vpow2.f32 %v1176_v2  ;;  %v1175_v4 = vsub.f32 %v1167_v60, %v1173_v3  ;;  %v2155_v2 = vld [vmem:[%s3136_s5 + $0x38] sm:$0xff]   ;;  %v2156_v3 = vld [vmem:[%s3136_s5 + $0x30] sm:$0xff]  }
 0x664   : > { %v1178_v5 = vmul.f32 1.442695, %v1175_v4  ;;  %v2157_v4 = vld [vmem:[%s3136_s5 + $0x28] sm:$0xff]  }
 0x666   : > { %2177 = vpow2.f32 %v1178_v5  ;;  %v2158_v5 = vld [vmem:[%s3136_s5 + $0x20] sm:$0xff]  }
 0x66f   : > { %v2176_v6 = vpop.eup %2175 }
 0x670   : > { %v1180_v8 = vsel %vm792_vm3, %v2176_v6, 0.0 }
 0x671   : > { %1181 = vadd.xlane.f32.xlu0 %v1180_v8  ;;  %v2160_v8 = vld [vmem:[%s3136_s5 + $0x10] sm:$0xff]  }
 0x673   : > { %v2178_v9 = vpop.eup %2177 }
 0x674   : > { %v1183_v10 = vsel %vm792_vm3, %v2178_v9, 0.0 }
 0x675   : > { %1184 = vadd.xlane.f32.xlu1 %v1183_v10  ;;  %v2162_v10 = vld [vmem:[%s3136_s5] sm:$0xff]  }
 0x687   : > { %1194 = vrot.lane.b32.xlu0 %v1819_v11, %s2542_s14  ;;  %s3137_s14 = sld [smem:[#allocation37_spill]] }
 0x68d   : > { %s3024_s17 = scalar_lea.hbm %s3137_s14, %s1847_s7 }
 0x6fa   : > { %v1182_v12 = vpop.xlane.xlu0 %1181 }
 0x6fb   : > { %2179 = vrcp.f32 %v1182_v12 }
 0x6fe   : > { %v1185_v13 = vpop.xlane.xlu1 %1184  ;;  %v1195_v14 = vpop.permute.xlu0 %1194 }
 0x6ff   : > { %2181 = vrcp.f32 %v1185_v13  ;;  %v1200_v15 = vsel %vm1060_vm9, %v1195_v14, 0 }
 0x700   : > { %1927 = vmatpush3.bf16.msra.mxu1 %v1200_v15 }
 0x701   : > { %1940 = vmatprep.subr.bf16.mxu1 %v2534_v7 }
 0x708   : > { %v2180_v16 = vpop.eup %2179 }
 0x709   : > { %v1188_v18 = vmul.f32 %v2180_v16, %v2176_v6  ;;  %v2159_v6 = vld [vmem:[%s3136_s5 + $0x18] sm:$0xff]  }
 0x70c   : > { %v2182_v17 = vpop.eup %2181 }
 0x70d   : > { %v1189_v19 = vmul.f32 %v2182_v17, %v2178_v9  ;;  %v2161_v9 = vld [vmem:[%s3136_s5 + $0x8] sm:$0xff]  }
 0x70f   : > { %v1190_v20 = vpack.c.bf16 %v1189_v19, %v1188_v18 }
 0x711   : > { %1929 = vmatmul.mubr.msk.bf16.vlgmr.msra.gmra.mxu1 %vm792_vm3, %v1190_v20 }
 0x712   : > { %1944 = vmatprep.mubr.msk.bf16.mxu1 %vm2535_vm1, %v2534_v7  ;;  %1941 = vmatpush3.bf16.msra.mxu1 %v2140_v22 }
 0x713   : > { %1942 = vmatprep.subr.bf16.mxu1 %v2534_v7 }
 0x716   : > { %1943 = vmatpush3.bf16.msra.mxu1 %v2142_v24 }
 0x717   : > { %1948 = vmatprep.subr.bf16.mxu1 %v2534_v7 }
 0x7d1   : > { %v1236_v25 = vpop.f32.mrf.mxu1 }
 0x7d3   : > { %v1930_v26 = vpop.f32.mrf.mxu1 }
 0x7d5   : > { %v1239_v27 = vpop.f32.mrf.mxu1 }
 0x7d6   : > { %v2125_v28 = vpack.i.bf16 %v1239_v27, %v1101_v53  ;;  %v2151_v53 = vld [vmem:[%s3086_s13 + $0x14] ss:$8 sps:$4 sm:$0xff]  }
 0x7d7   : > { %v1931_v29 = vpop.f32.mrf.mxu1 }
 0x7d8   : > { %2126 = vrot.lane.b32.xlu1 %v2125_v28, %s2544_s28  ;;  %s2546_s28 = smov [#allocation19]  }
 0x7d9   : > { %s2429_s29 = sshll.u32 %s2546_s28, 4  ;;  %s2430_s29 = int_to_ptr.vmem [resolvable:$false] %s2429_s29 }
 0x7da   : > { %s2431_s16 = scalar_lea.vmem %s2430_s29, 256  ;;  %p2432_p0 = scmp.lt.s32.totalorder %s3026_s26, %s2430_s29 }
 0x7db   : > { %p2433_p5 = scmp.lt.s32.totalorder %s2431_s16, %s2425_s12 }
 0x7dd   : > { %p2434_p6 = por %p2433_p5, %p2432_p0 }
 0x7df   : > { %p2435_p8 = pnand %p2434_p6, %p2428_p1 }
 0x84a   : > { %v2127_v30 = vpop.permute.xlu1 %2126 }
 0x84b   : > { %v2129_v31 = vunpack.i.h.bf16 %v2127_v30  ;;  %v2128_v32 = vunpack.i.l.bf16 %v2127_v30 }
 0x84d   : > { %v1247_v34 = vsel %vm984_vm6, %v1236_v25, %v2129_v31  ;;  %v1109_v35 = vsel %vm984_vm6, %v2927_v51, %v2128_v32  ;;  %v2146_v51 = vld [vmem:[%s3086_s13 + $0x20] ss:$8 sps:$4 sm:$0xff]  }
 0x84e   : > { %v1248_v36 = vpack.c.bf16 %v1247_v34, %v1247_v34  ;;  %v1110_v37 = vpack.c.bf16 %v1109_v35, %v1109_v35 }
 0x850   : > { %1937 = vmatmul.mubr.msk.bf16.vlgmr.msra.gmra.mxu0 %vm1261_vm10, %v1248_v36  ;;  %1945 = vmatmul.mubr.msk.bf16.vlgmr.msra.gmra.mxu1 %vm1261_vm10, %v1110_v37 }
 0x851   : > { %1964 = vmatprep.mubr.msk.bf16.mxu1 %vm2535_vm1, %v2534_v7  ;;  %1438 = vmatpush1.bf16.msra.mxu0 %v2143_v49 }
 0x852   : > { %1461 = vmatprep.mubr.bf16.mxu0 %v2545_v52  ;;  %1949 = vmatpush3.bf16.msra.mxu1 %v2155_v2 }
 0x853   : > { %1950 = vmatprep.subr.bf16.mxu1 %v2534_v7 }
 0x856   : > { %1951 = vmatpush3.bf16.msra.mxu1 %v2156_v3 }
 0x857   : > { %1952 = vmatprep.subr.bf16.mxu1 %v2534_v7 }
 0x85a   : > { %1953 = vmatpush3.bf16.msra.mxu1 %v2157_v4 }
 0x85b   : > { %1954 = vmatprep.subr.bf16.mxu1 %v2534_v7 }
 0x85e   : > { %1955 = vmatpush3.bf16.msra.mxu1 %v2158_v5 }
 0x85f   : > { %1956 = vmatprep.subr.bf16.mxu1 %v2534_v7 }
 0x862   : > { %1957 = vmatpush3.bf16.msra.mxu1 %v2159_v6 }
 0x863   : > { %1958 = vmatprep.subr.bf16.mxu1 %v2534_v7 }
 0x866   : > { %1959 = vmatpush3.bf16.msra.mxu1 %v2160_v8 }
 0x867   : > { %1960 = vmatprep.subr.bf16.mxu1 %v2534_v7 }
 0x86a   : > { %1961 = vmatpush3.bf16.msra.mxu1 %v2161_v9 }
 0x86b   : > { %1962 = vmatprep.subr.bf16.mxu1 %v2534_v7 }
 0x86e   : > { %1963 = vmatpush3.bf16.msra.mxu1 %v2162_v10 }
 0x910   : > { %v1299_v33 = vpop.f32.mrf.mxu0  ;;  %v1354_v38 = vpop.f32.mrf.mxu1 }
 0x911   : > { %v1355_v39 = vadd.f32 %v1354_v38, %v1299_v33 }
 0x912   : > { %v1938_v40 = vpop.f32.mrf.mxu0  ;;  %v1946_v41 = vpop.f32.mrf.mxu1 }
 0x913   : > { %v2952_v42 = vadd.f32 %v1355_v39, %v2839_v0  ;;  %v2148_v0 = vld [vmem:[%s3086_s13 + $0x24] ss:$8 sps:$4 sm:$0xff]  }
 0x914   : > { %v1302_v43 = vpop.f32.mrf.mxu0  ;;  %v1357_v44 = vpop.f32.mrf.mxu1  ;;  %1439 = vmatprep.subr.bf16.mxu0 %v2148_v0 }
 0x915   : > { %v1362_v45 = vmul.f32 %v2952_v42, %v2952_v42  ;;  %1440 = vmatpush1.bf16.msra.mxu0 %v2146_v51 }
 0x916   : > { %v1939_v46 = vpop.f32.mrf.mxu0  ;;  %v1947_v47 = vpop.f32.mrf.mxu1  ;;  %1441 = vmatprep.subr.bf16.mxu0 %v2151_v53 }
 0x917   : > { %v1363_v48 = vsel %vm685_vm0, %v1362_v45, 0.0 }
 0x918   : > { %1364 = vadd.xlane.f32.xlu1 %v1363_v48 }
 0x919   : > { %1442 = vmatpush1.bf16.msra.mxu0 %v2149_v54 }
 0x91a   : > { %1443 = vmatprep.subr.bf16.mxu0 %v2154_v55 }
 0x91d   : > { %1444 = vmatpush1.bf16.msra.mxu0 %v2152_v56 }
 0x9a1   : > { %v1365_v57 = vpop.xlane.xlu1 %1364 }
 0x9a2   : > { %v1366_v58 = vmul.f32 0.015625, %v1365_v57 }
 0x9a4   : > { %v1367_v59 = vadd.f32 1e-05, %v1366_v58 }
 0x9a6   : > { %2183 = vrsqrt.f32 %v1367_v59 }
 0x9b3   : > { %v2184_v60 = vpop.eup %2183 }
 0x9b4   : > { %v1369_v62 = vmul.f32 %v2184_v60, %v2952_v42 }
 0x9b6   : > { %v1376_v63 = vmul.f32 %v1827_v61, %v1369_v62 }
 0x9b8   : > { %v1377_v1 = vpack.c.bf16 %v1376_v63, %v1376_v63 }
 0x9ba   : > { %1836 = vmatmul.mubr.msk.bf16.vlgmr.msra.gmra.mxu0 %vm685_vm0, %v1377_v1 }
 0xa7a   : > { %v1463_v11 = vpop.f32.mrf.mxu0 }
 0xa7b   : > { %v1837_v12 = vmul.f32 -1.442695, %v1463_v11 }
 0xa7c   : > { %v1465_v13 = vpop.f32.mrf.mxu0 }
 0xa7d   : > { %2185 = vpow2.f32 %v1837_v12 }
 0xa7e   : > { %v1467_v14 = vpop.f32.mrf.mxu0 }
 0xa80   : > { %v1468_v15 = vpop.f32.mrf.mxu0 }
 0xa8a   : > { %v2186_v16 = vpop.eup %2185 }
 0xa8b   : > { %v1473_v17 = vadd.f32 1.0, %v2186_v16 }
 0xa8d   : > { %2187 = vrcp.f32 %v1473_v17 }
 0xa9a   : > { %v2188_v18 = vpop.eup %2187 }
 0xa9b   : > { %v1476_v19 = vmul.f32 %v2188_v18, %v1463_v11 }
 0xa9d   : > { %v1477_v7 = vmul.f32 %v1476_v19, %v1465_v13 }
 0xa9f   : > { %v1478_v20 = vpack.c.bf16 %v1477_v7, %v1477_v7 }
 0xaa1   : > { %1965 = vmatmul.mubr.bf16.vlgmr.msra.gmra.mxu1 %v1478_v20 }
 0xb61   : > { %v1577_v21 = vpop.f32.mrf.mxu1 }
 0xb62   : > { %v1583_v22 = vadd.f32 %v1577_v21, %v2952_v42 }
 0xb63   : > { %v1966_v23 = vpop.f32.mrf.mxu1 }
 0xb64   : > { %1584 = vst.msk [vmem:[%s669_s11] sm:$0xff] %vm685_vm0, %v1583_v22 }
 0xb65   : > { %v1580_v24 = vpop.f32.mrf.mxu1 }
 0xb66   : > { %2438 = shalt.err (!%p2435_p8)
}
 0xb67   : > { %s2439_s24 = scalar_lea.hbm %s3024_s17, 128  ;;  %s2443_s30 = scalar_lea.hbm %s3137_s14, 256 }
 0xb68   : > { %p2440_p9 = scmp.ne.s32.totalorder %s3024_s17, %s2439_s24  ;;  %p2444_p3 = scmp.lt.s32.totalorder %s3024_s17, %s3137_s14 }
 0xb69   : > { %p2445_p10 = scmp.lt.s32.totalorder %s2443_s30, %s2439_s24 }
 0xb6a   : > { %p2441_p2 = pnand %p2440_p9, %p2778_p11 }
 0xb6b   : > { %p2446_p4 = por %p2445_p10, %p2444_p3 }
 0xb6c   : > { %p2442_p12 = pneg %p2441_p2 }
 0xb6e   : > { %p2447_p7 = pnand %p2446_p4, %p2442_p12 }
 0xb70   : > { %2450 = shalt.err (!%p2447_p7)
}
 0xb71   : > { %2002 = dma.vmem_to_hbm [thread:$0]  (%p2778_p11), %s3026_s26, 128, %s3024_s17, %s1586_s21   ;;  %v1967_v25 = vpop.f32.mrf.mxu1 }
 0xb72 PF: > { %s1612_s11 = sand.u32 1, %s2501_s18   ;;  %p3138_p1 = scmp.ge.s32.totalorder %s2521_s23, 2 }
 0xb73   : > { %s1613_s2 = scalar_lea.sflag [#allocation6], %s1612_s11 }
 0xb74   : > { %p2034_p0 = pnand %p3138_p1, %p2785_p13 }
 0xb76   : > { %p2035_p5 = pneg %p2034_p0 }
 0xb78   : > { %2496 = dma.done.wait (%p2035_p5), %s1613_s2, 128  }
 0xb79   : > { %2498 = vsyncadd (%p2035_p5), %s1613_s2, 4294967168  ;;  %s35_s23 = sadd.s32 1, %s2521_s23   ;;  %s3139_s4 = sld [smem:[#allocation26_spill]] }
 0xb7a   : > { %p32_p6 = scmp.ge.s32.totalorder %s35_s23, 4   ;;  %s3140_s18 = smov %s2505_s19 }
 0xb7b   : > { %s3141_s19 = smov %s2509_s20  ;;  %s3142_s20 = smov %s2783_s9 }
 0xb7c   : > { %s3143_s21 = smov %s2517_s22  ;;  %34 = sbr.rel (!%p32_p6) target bundleno = 22 (0x16), region = 167 }
 0xb7f   : > { %s3144_s22 = smov %s3139_s4 }
 0xb81   :  { %1618 = vsyncpa [#allocation5], 1 }
 0xb82   :  { %1620 = vsyncpa [#allocation5 + $0x1], 1 }
 0xb83   :  { %1621 = vsyncpa [#allocation8], 1 }
 0xb84   :  { %1622 = vsyncpa [#allocation11], 1 }
 0xb85   :  { %1623 = vsyncpa [#allocation14], 1 }
 0xb86   :  { %1624 = vsyncpa [#allocation17], 1 }
 0xb87   :  { %1625 = vsyncpa [#allocation6], 1 }
 0xb88   :  { %1627 = vsyncpa [#allocation6 + $0x1], 1 }

</bundles_post_ra>
